<compile_context>
chip_gen: v7x
topology: tpu7x:2x2x1
jax: 0.10.0
libtpu: 0.0.40
codegen_flags: <defaults>
</compile_context>

<pallas_src>
import functools

import jax
import jax.numpy as jnp
from jax.experimental import pallas as pl
from jax.experimental.pallas import tpu as pltpu

EPS = 1e-5
_LANE = 128
_MIB = 1024 * 1024


def _round_up(v, m):
    return ((v + m - 1) // m) * m


def _vmem_limit_bytes():
    """Generation-aware scoped-VMEM limit (~48 MiB on v7x, ~100 MiB on v5e/v6e)."""
    cap = 64 * _MIB
    try:
        cap = int(pltpu.get_tpu_info().vmem_capacity_bytes)
    except Exception:
        pass
    return max(min(cap - 16 * _MIB, 100 * _MIB), 32 * _MIB)


# --------------------------------------------------------------------------- #
# Pass 1: tap-wise conv (f32 MXU accumulation) + per-tile BN partial stats
# --------------------------------------------------------------------------- #
def _conv_stats_kernel(x_ref, w_ref, conv_ref, stats_ref, *,
                       Bt, Rt, W, K, Cin_p, Cout_p):
    x = x_ref[...]                                   # [Bt, 1, Rt+2p, Wp, Cin_p]
    w = w_ref[...]                                   # [K*K, Cin_p, Cout_p]
    rows = Bt * Rt * W

    acc = jnp.zeros((rows, Cout_p), jnp.float32)
    for dy in range(K):                              # static unroll: K*K MXU matmuls
        for dx in range(K):
            patch = x[:, 0, dy:dy + Rt, dx:dx + W, :].reshape(rows, Cin_p)
            acc = acc + jnp.dot(patch, w[dy * K + dx],
                                preferred_element_type=jnp.float32)

    conv_ref[...] = acc.reshape(Bt, Rt, W, Cout_p).astype(conv_ref.dtype)

    # Per-tile partials around the tile mean (merged with Chan's formula in the
    # wrapper) -> avoids one-pass E[x^2]-E[x]^2 cancellation.
    s = jnp.sum(acc, axis=0, keepdims=True)          # [1, Cout_p]
    mu = s * (1.0 / rows)
    d = acc - mu
    m2 = jnp.sum(d * d, axis=0, keepdims=True)       # [1, Cout_p]
    stats_ref[...] = jnp.concatenate([s, m2], axis=0).reshape(1, 1, 2, Cout_p)


# --------------------------------------------------------------------------- #
# Pass 2: BN (precomputed per-channel scale/bias) + SiLU (+ residual)
# --------------------------------------------------------------------------- #
def _bn_silu_res_kernel(*refs, res):
    if res:
        conv_ref, res_ref, scale_ref, bias_ref, out_ref = refs
    else:
        conv_ref, scale_ref, bias_ref, out_ref = refs
        res_ref = None

    scale = scale_ref[...].reshape(1, 1, 1, -1)
    bias = bias_ref[...].reshape(1, 1, 1, -1)
    y = conv_ref[...].astype(jnp.float32) * scale + bias
    # SiLU: sigmoid(y) = 0.5*tanh(0.5*y) + 0.5 -> a single EUP transcendental,
    # keeping the VALU / store slots free (pass 2 is memory-bound).
    y = y * (0.5 * jnp.tanh(0.5 * y) + 0.5)
    if res:
        y = y + res_ref[...].astype(jnp.float32)
    out_ref[...] = y.astype(out_ref.dtype)


# --------------------------------------------------------------------------- #
# Wrapper
# --------------------------------------------------------------------------- #
def conv_bn_silu(x_nchw, weight_oihw, gamma, beta, *, kernel_size=3, dilation=1,
                 res=True, mxu_dtype=jnp.bfloat16, block_rows=None, block_batch=None):
    """x_nchw: [N, Cin, H, W]; weight_oihw: [Cout, Cin, K, K]; gamma/beta: [Cout]."""
    assert dilation == 1, "only dilation=1 path implemented"
    N, Cin, H, W = x_nchw.shape
    Cout, Cin_w, K, K2 = weight_oihw.shape
    assert Cin_w == Cin and K == kernel_size and K2 == kernel_size
    if res:
        assert Cin == Cout, "residual requires in_ch == out_ch"
    pad = kernel_size // 2
    Hp, Wp = H + 2 * pad, W + 2 * pad

    Cin_p = _round_up(Cin, _LANE)        # lane-dense channels (review item 2)
    Cout_p = _round_up(Cout, _LANE)

    vmem_limit = _vmem_limit_bytes()
    xbytes = jnp.dtype(mxu_dtype).itemsize

    # ---- tile selection: row blocks (K//2 halo) x batch blocks ---------------- #
    budget = vmem_limit // 2             # headroom for double buffering / scratch
    w_bytes = K * K * Cin_p * Cout_p * xbytes

    def step_bytes(bt, rt):
        in_x = bt * (rt + 2 * pad) * Wp * Cin_p * xbytes
        out_c = bt * rt * W * Cout_p * 4
        res_x = bt * rt * W * Cin_p * 4
        scratch = bt * rt * W * (Cout_p + Cin_p) * 4   # acc + per-tap temporaries
        return 2 * (in_x + out_c + res_x) + 2 * w_bytes + scratch

    if block_rows is None:
        block_rows = 1
        for rt in sorted((d for d in range(1, H + 1) if H % d == 0), reverse=True):
            if step_bytes(1, rt) <= budget:
                block_rows = rt
                break
    assert H % block_rows == 0
    Rt = block_rows
    n_rb = H // Rt

    if block_batch is None:
        divs = sorted((d for d in range(1, N + 1) if N % d == 0), reverse=True)
        fitting = [d for d in divs if step_bytes(d, Rt) <= budget] or [1]
        multi = [d for d in fitting if (N // d) * n_rb >= 2]   # keep >=2 pipeline steps
        block_batch = multi[0] if multi else fitting[0]
    assert N % block_batch == 0
    Bt = block_batch
    nb = N // Bt

    # ---- wrapper-side layout prep (single XLA pad/transpose pass) ------------- #
    x_nhwc = jnp.transpose(x_nchw, (0, 2, 3, 1)).astype(jnp.float32)
    x_pad = jnp.pad(x_nhwc, ((0, 0), (pad, pad), (pad, pad), (0, Cin_p - Cin)))
    x_pad = x_pad.astype(mxu_dtype)                           # [N, Hp, Wp, Cin_p]

    # Overlapping row windows (halo = K//2 rows); pure reshape when n_rb == 1.
    if n_rb == 1:
        x_blk = x_pad.reshape(N, 1, Hp, Wp, Cin_p)
    else:
        x_blk = jnp.stack([x_pad[:, r * Rt:r * Rt + Rt + 2 * pad]
                           for r in range(n_rb)], axis=1)     # [N, n_rb, Rt+2p, Wp, Cin_p]

    # [Cout, Cin, K, K] -> [K*K, Cin_p, Cout_p]
    w_taps = jnp.transpose(weight_oihw, (2, 3, 1, 0)).reshape(K * K, Cin, Cout)
    w_taps = jnp.pad(w_taps.astype(jnp.float32),
                     ((0, 0), (0, Cin_p - Cin), (0, Cout_p - Cout))).astype(mxu_dtype)

    cparams = pltpu.CompilerParams(dimension_semantics=("parallel", "parallel"),
                                   vmem_limit_bytes=vmem_limit)

    conv_spec = pl.BlockSpec((Bt, Rt, W, Cout_p), lambda b, r: (b, r, 0, 0))

    # ---- pass 1: tap-wise conv + per-tile BN partials -------------------------- #
    flops1 = 2 * N * H * W * K * K * Cin_p * Cout_p
    bytes1 = (x_blk.size * xbytes + w_taps.size * xbytes
              + N * H * W * Cout_p * 4 + nb * n_rb * 2 * Cout_p * 4)
    conv_out, partial = pl.pallas_call(
        functools.partial(_conv_stats_kernel, Bt=Bt, Rt=Rt, W=W, K=K,
                          Cin_p=Cin_p, Cout_p=Cout_p),
        grid=(nb, n_rb),
        in_specs=[pl.BlockSpec((Bt, 1, Rt + 2 * pad, Wp, Cin_p),
                               lambda b, r: (b, r, 0, 0, 0)),
                  pl.BlockSpec((K * K, Cin_p, Cout_p), lambda b, r: (0, 0, 0))],
        out_specs=(conv_spec,
                   pl.BlockSpec((1, 1, 2, Cout_p), lambda b, r: (b, r, 0, 0))),
        out_shape=(jax.ShapeDtypeStruct((N, H, W, Cout_p), jnp.float32),
                   jax.ShapeDtypeStruct((nb, n_rb, 2, Cout_p), jnp.float32)),
        compiler_params=cparams,
        cost_estimate=pl.CostEstimate(flops=int(flops1), transcendentals=0,
                                      bytes_accessed=int(bytes1)),
    )(x_blk, w_taps)

    # ---- glue: merge per-tile stats (Chan), build BN scale/bias ---------------- #
    cnt_tile = Bt * Rt * W
    n_tiles = nb * n_rb
    total = N * H * W
    sums = partial[:, :, 0, :].reshape(n_tiles, Cout_p)
    m2s = partial[:, :, 1, :].reshape(n_tiles, Cout_p)
    tile_mean = sums / cnt_tile
    mean = jnp.mean(tile_mean, axis=0)
    m2 = jnp.sum(m2s, axis=0) + cnt_tile * jnp.sum((tile_mean - mean) ** 2, axis=0)
    var = jnp.maximum(m2 / total, 0.0)                         # biased (training BN)
    inv_std = jax.lax.rsqrt(var + EPS)

    gamma_p = jnp.pad(gamma.astype(jnp.float32), (0, Cout_p - Cout))
    beta_p = jnp.pad(beta.astype(jnp.float32), (0, Cout_p - Cout))
    scale = (gamma_p * inv_std).reshape(1, Cout_p)
    bias = (beta_p - mean * gamma_p * inv_std).reshape(1, Cout_p)

    # ---- pass 2: normalize + SiLU + residual ----------------------------------- #
    in_arrays = [conv_out]
    in_specs = [conv_spec]
    if res:
        # Residual read straight from the unpadded x (no padded-interior slice).
        x_res = jnp.pad(x_nhwc, ((0, 0), (0, 0), (0, 0), (0, Cin_p - Cin)))
        in_arrays.append(x_res)
        in_specs.append(pl.BlockSpec((Bt, Rt, W, Cin_p), lambda b, r: (b, r, 0, 0)))
    in_arrays += [scale, bias]
    in_specs += [pl.BlockSpec((1, Cout_p), lambda b, r: (0, 0)),
                 pl.BlockSpec((1, Cout_p), lambda b, r: (0, 0))]

    flops2 = 6 * N * H * W * Cout_p
    bytes2 = (2 * N * H * W * Cout_p * 4
              + (N * H * W * Cin_p * 4 if res else 0) + 2 * Cout_p * 4)
    out_nhwc = pl.pallas_call(
        functools.partial(_bn_silu_res_kernel, res=res),
        grid=(nb, n_rb),
        in_specs=in_specs,
        out_specs=conv_spec,
        out_shape=jax.ShapeDtypeStruct((N, H, W, Cout_p), jnp.float32),
        compiler_params=cparams,
        cost_estimate=pl.CostEstimate(flops=int(flops2),
                                      transcendentals=N * H * W * Cout_p,
                                      bytes_accessed=int(bytes2)),
    )(*in_arrays)

    out = out_nhwc[..., :Cout]
    return jnp.transpose(out, (0, 3, 1, 2)).astype(x_nchw.dtype)


# --------------------------------------------------------------------------- #
# Pure-JAX reference mirroring the PyTorch forward (training-mode BN)
# --------------------------------------------------------------------------- #
def _reference(x_nchw, weight_oihw, gamma, beta, *, res=True):
    K = weight_oihw.shape[2]
    p = K // 2
    conv = jax.lax.conv_general_dilated(
        x_nchw.astype(jnp.float32), weight_oihw.astype(jnp.float32),
        window_strides=(1, 1), padding=((p, p), (p, p)),
        dimension_numbers=("NCHW", "OIHW", "NCHW"))
    mean = jnp.mean(conv, axis=(0, 2, 3), keepdims=True)
    var = jnp.mean((conv - mean) ** 2, axis=(0, 2, 3), keepdims=True)
    y = (conv - mean) * jax.lax.rsqrt(var + EPS)
    y = y * gamma.reshape(1, -1, 1, 1) + beta.reshape(1, -1, 1, 1)
    y = y * jax.nn.sigmoid(y)
    return x_nchw + y if res else y


if __name__ == "__main__":
    key = jax.random.PRNGKey(0)
    k_x, k_w, k_g, k_b = jax.random.split(key, 4)

    N, C, H, W = 2, 4, 16, 16          # in_ch == out_ch (res=True)
    KSIZE = 3

    x = jax.random.normal(k_x, (N, C, H, W), dtype=jnp.float32)
    weight = jax.random.normal(k_w, (C, C, KSIZE, KSIZE), dtype=jnp.float32) * 0.1
    gamma = 1.0 + 0.1 * jax.random.normal(k_g, (C,), dtype=jnp.float32)
    beta = 0.1 * jax.random.normal(k_b, (C,), dtype=jnp.float32)

    ref = _reference(x, weight, gamma, beta, res=True)

    # Default fast path: bf16 MXU operands, f32 accumulation.
    fast = jax.jit(functools.partial(conv_bn_silu, kernel_size=KSIZE, res=True))
    out_fast = jax.block_until_ready(fast(x, weight, gamma, beta))
    assert out_fast.shape == (N, C, H, W)
    err_fast = float(jnp.max(jnp.abs(out_fast - ref)))
    assert err_fast < 5e-2, f"bf16-operand path error too large: {err_fast}"

    # Exact path: f32 MXU operands.
    exact = jax.jit(functools.partial(conv_bn_silu, kernel_size=KSIZE, res=True,
                                      mxu_dtype=jnp.float32))
    out_exact = jax.block_until_ready(exact(x, weight, gamma, beta))
    err_exact = float(jnp.max(jnp.abs(out_exact - ref)))
    assert err_exact < 1e-4, f"f32 path error too large: {err_exact}"

    # Forced row-block tiling (exercises the halo windows, batch blocking and the
    # multi-tile Chan stats merge).
    tiled = jax.jit(functools.partial(conv_bn_silu, kernel_size=KSIZE, res=True,
                                      mxu_dtype=jnp.float32, block_rows=8))
    out_tiled = jax.block_until_ready(tiled(x, weight, gamma, beta))
    err_tiled = float(jnp.max(jnp.abs(out_tiled - ref)))
    assert err_tiled < 1e-4, f"row-block path error too large: {err_tiled}"

    print("KERNEL_OK")
</pallas_src>

<mosaic_0001>
module attributes {stable_mosaic.version = 11 : i64} {
  func.func @_conv_stats_kernel(%arg0: i32, %arg1: i32, %arg2: memref<1x1x18x18x128xbf16, #tpu.memory_space<vmem>>, %arg3: memref<9x128x128xbf16, #tpu.memory_space<vmem>>, %arg4: memref<1x16x16x128xf32, #tpu.memory_space<vmem>>, %arg5: memref<1x1x2x128xf32, #tpu.memory_space<vmem>>) attributes {dimension_semantics = [#tpu.dimension_semantics<parallel>, #tpu.dimension_semantics<parallel>], iteration_bounds = array<i64: 2, 1>, scalar_prefetch = 0 : i64, scratch_operands = 0 : i64, tpu.core_type = #tpu.core_type<tc>, window_params = [{transform_indices = @transform_0, window_bounds = array<i64: 1, 1, 18, 18, 128>}, {pipeline_mode = #tpu.pipeline_mode<synchronous>, transform_indices = @transform_1, window_bounds = array<i64: 9, 128, 128>}, {transform_indices = @transform_2, window_bounds = array<i64: 1, 16, 16, 128>}, {transform_indices = @transform_3, window_bounds = array<i64: 1, 1, 2, 128>}]} {
    %c0 = arith.constant 0 : index
    %c0_0 = arith.constant 0 : index
    %c0_1 = arith.constant 0 : index
    %c0_2 = arith.constant 0 : index
    %c0_3 = arith.constant 0 : index
    %0 = vector.load %arg2[%c0, %c0_0, %c0_1, %c0_2, %c0_3] : memref<1x1x18x18x128xbf16, #tpu.memory_space<vmem>>, vector<1x1x18x18x128xbf16>
    %c0_4 = arith.constant 0 : index
    %c0_5 = arith.constant 0 : index
    %c0_6 = arith.constant 0 : index
    %1 = vector.load %arg3[%c0_4, %c0_5, %c0_6] : memref<9x128x128xbf16, #tpu.memory_space<vmem>>, vector<9x128x128xbf16>
    %cst = arith.constant 0.000000e+00 : f32
    %2 = vector.broadcast %cst : f32 to vector<256x128xf32>
    %3 = vector.extract_strided_slice %0 {offsets = [0, 0, 0, 0, 0], sizes = [1, 1, 16, 16, 128], strides = [1, 1, 1, 1, 1]} : vector<1x1x18x18x128xbf16> to vector<1x1x16x16x128xbf16>
    %4 = vector.shape_cast %3 : vector<1x1x16x16x128xbf16> to vector<1x16x16x128xbf16>
    %5 = vector.shape_cast %4 : vector<1x16x16x128xbf16> to vector<256x128xbf16>
    %6 = vector.extract_strided_slice %1 {offsets = [0, 0, 0], sizes = [1, 128, 128], strides = [1, 1, 1]} : vector<9x128x128xbf16> to vector<1x128x128xbf16>
    %7 = vector.shape_cast %6 : vector<1x128x128xbf16> to vector<128x128xbf16>
    %cst_7 = arith.constant dense<0.000000e+00> : vector<256x128xf32>
    %8 = tpu.matmul %5, %7, %cst_7 {dimension_numbers = #tpu.dot_dimension_numbers<[1], [0], [0], [1], [0, 0, 1, 1], [], []>} : vector<256x128xbf16>, vector<128x128xbf16>, vector<256x128xf32> -> vector<256x128xf32>
    %9 = arith.addf %2, %8 : vector<256x128xf32>
    %10 = vector.extract_strided_slice %0 {offsets = [0, 0, 0, 1, 0], sizes = [1, 1, 16, 16, 128], strides = [1, 1, 1, 1, 1]} : vector<1x1x18x18x128xbf16> to vector<1x1x16x16x128xbf16>
    %11 = vector.shape_cast %10 : vector<1x1x16x16x128xbf16> to vector<1x16x16x128xbf16>
    %12 = vector.shape_cast %11 : vector<1x16x16x128xbf16> to vector<256x128xbf16>
    %13 = vector.extract_strided_slice %1 {offsets = [1, 0, 0], sizes = [1, 128, 128], strides = [1, 1, 1]} : vector<9x128x128xbf16> to vector<1x128x128xbf16>
    %14 = vector.shape_cast %13 : vector<1x128x128xbf16> to vector<128x128xbf16>
    %cst_8 = arith.constant dense<0.000000e+00> : vector<256x128xf32>
    %15 = tpu.matmul %12, %14, %cst_8 {dimension_numbers = #tpu.dot_dimension_numbers<[1], [0], [0], [1], [0, 0, 1, 1], [], []>} : vector<256x128xbf16>, vector<128x128xbf16>, vector<256x128xf32> -> vector<256x128xf32>
    %16 = arith.addf %9, %15 : vector<256x128xf32>
    %17 = vector.extract_strided_slice %0 {offsets = [0, 0, 0, 2, 0], sizes = [1, 1, 16, 16, 128], strides = [1, 1, 1, 1, 1]} : vector<1x1x18x18x128xbf16> to vector<1x1x16x16x128xbf16>
    %18 = vector.shape_cast %17 : vector<1x1x16x16x128xbf16> to vector<1x16x16x128xbf16>
    %19 = vector.shape_cast %18 : vector<1x16x16x128xbf16> to vector<256x128xbf16>
    %20 = vector.extract_strided_slice %1 {offsets = [2, 0, 0], sizes = [1, 128, 128], strides = [1, 1, 1]} : vector<9x128x128xbf16> to vector<1x128x128xbf16>
    %21 = vector.shape_cast %20 : vector<1x128x128xbf16> to vector<128x128xbf16>
    %cst_9 = arith.constant dense<0.000000e+00> : vector<256x128xf32>
    %22 = tpu.matmul %19, %21, %cst_9 {dimension_numbers = #tpu.dot_dimension_numbers<[1], [0], [0], [1], [0, 0, 1, 1], [], []>} : vector<256x128xbf16>, vector<128x128xbf16>, vector<256x128xf32> -> vector<256x128xf32>
    %23 = arith.addf %16, %22 : vector<256x128xf32>
    %24 = vector.extract_strided_slice %0 {offsets = [0, 0, 1, 0, 0], sizes = [1, 1, 16, 16, 128], strides = [1, 1, 1, 1, 1]} : vector<1x1x18x18x128xbf16> to vector<1x1x16x16x128xbf16>
    %25 = vector.shape_cast %24 : vector<1x1x16x16x128xbf16> to vector<1x16x16x128xbf16>
    %26 = vector.shape_cast %25 : vector<1x16x16x128xbf16> to vector<256x128xbf16>
    %27 = vector.extract_strided_slice %1 {offsets = [3, 0, 0], sizes = [1, 128, 128], strides = [1, 1, 1]} : vector<9x128x128xbf16> to vector<1x128x128xbf16>
    %28 = vector.shape_cast %27 : vector<1x128x128xbf16> to vector<128x128xbf16>
    %cst_10 = arith.constant dense<0.000000e+00> : vector<256x128xf32>
    %29 = tpu.matmul %26, %28, %cst_10 {dimension_numbers = #tpu.dot_dimension_numbers<[1], [0], [0], [1], [0, 0, 1, 1], [], []>} : vector<256x128xbf16>, vector<128x128xbf16>, vector<256x128xf32> -> vector<256x128xf32>
    %30 = arith.addf %23, %29 : vector<256x128xf32>
    %31 = vector.extract_strided_slice %0 {offsets = [0, 0, 1, 1, 0], sizes = [1, 1, 16, 16, 128], strides = [1, 1, 1, 1, 1]} : vector<1x1x18x18x128xbf16> to vector<1x1x16x16x128xbf16>
    %32 = vector.shape_cast %31 : vector<1x1x16x16x128xbf16> to vector<1x16x16x128xbf16>
    %33 = vector.shape_cast %32 : vector<1x16x16x128xbf16> to vector<256x128xbf16>
    %34 = vector.extract_strided_slice %1 {offsets = [4, 0, 0], sizes = [1, 128, 128], strides = [1, 1, 1]} : vector<9x128x128xbf16> to vector<1x128x128xbf16>
    %35 = vector.shape_cast %34 : vector<1x128x128xbf16> to vector<128x128xbf16>
    %cst_11 = arith.constant dense<0.000000e+00> : vector<256x128xf32>
    %36 = tpu.matmul %33, %35, %cst_11 {dimension_numbers = #tpu.dot_dimension_numbers<[1], [0], [0], [1], [0, 0, 1, 1], [], []>} : vector<256x128xbf16>, vector<128x128xbf16>, vector<256x128xf32> -> vector<256x128xf32>
    %37 = arith.addf %30, %36 : vector<256x128xf32>
    %38 = vector.extract_strided_slice %0 {offsets = [0, 0, 1, 2, 0], sizes = [1, 1, 16, 16, 128], strides = [1, 1, 1, 1, 1]} : vector<1x1x18x18x128xbf16> to vector<1x1x16x16x128xbf16>
    %39 = vector.shape_cast %38 : vector<1x1x16x16x128xbf16> to vector<1x16x16x128xbf16>
    %40 = vector.shape_cast %39 : vector<1x16x16x128xbf16> to vector<256x128xbf16>
    %41 = vector.extract_strided_slice %1 {offsets = [5, 0, 0], sizes = [1, 128, 128], strides = [1, 1, 1]} : vector<9x128x128xbf16> to vector<1x128x128xbf16>
    %42 = vector.shape_cast %41 : vector<1x128x128xbf16> to vector<128x128xbf16>
    %cst_12 = arith.constant dense<0.000000e+00> : vector<256x128xf32>
    %43 = tpu.matmul %40, %42, %cst_12 {dimension_numbers = #tpu.dot_dimension_numbers<[1], [0], [0], [1], [0, 0, 1, 1], [], []>} : vector<256x128xbf16>, vector<128x128xbf16>, vector<256x128xf32> -> vector<256x128xf32>
    %44 = arith.addf %37, %43 : vector<256x128xf32>
    %45 = vector.extract_strided_slice %0 {offsets = [0, 0, 2, 0, 0], sizes = [1, 1, 16, 16, 128], strides = [1, 1, 1, 1, 1]} : vector<1x1x18x18x128xbf16> to vector<1x1x16x16x128xbf16>
    %46 = vector.shape_cast %45 : vector<1x1x16x16x128xbf16> to vector<1x16x16x128xbf16>
    %47 = vector.shape_cast %46 : vector<1x16x16x128xbf16> to vector<256x128xbf16>
    %48 = vector.extract_strided_slice %1 {offsets = [6, 0, 0], sizes = [1, 128, 128], strides = [1, 1, 1]} : vector<9x128x128xbf16> to vector<1x128x128xbf16>
    %49 = vector.shape_cast %48 : vector<1x128x128xbf16> to vector<128x128xbf16>
    %cst_13 = arith.constant dense<0.000000e+00> : vector<256x128xf32>
    %50 = tpu.matmul %47, %49, %cst_13 {dimension_numbers = #tpu.dot_dimension_numbers<[1], [0], [0], [1], [0, 0, 1, 1], [], []>} : vector<256x128xbf16>, vector<128x128xbf16>, vector<256x128xf32> -> vector<256x128xf32>
    %51 = arith.addf %44, %50 : vector<256x128xf32>
    %52 = vector.extract_strided_slice %0 {offsets = [0, 0, 2, 1, 0], sizes = [1, 1, 16, 16, 128], strides = [1, 1, 1, 1, 1]} : vector<1x1x18x18x128xbf16> to vector<1x1x16x16x128xbf16>
    %53 = vector.shape_cast %52 : vector<1x1x16x16x128xbf16> to vector<1x16x16x128xbf16>
    %54 = vector.shape_cast %53 : vector<1x16x16x128xbf16> to vector<256x128xbf16>
    %55 = vector.extract_strided_slice %1 {offsets = [7, 0, 0], sizes = [1, 128, 128], strides = [1, 1, 1]} : vector<9x128x128xbf16> to vector<1x128x128xbf16>
    %56 = vector.shape_cast %55 : vector<1x128x128xbf16> to vector<128x128xbf16>
    %cst_14 = arith.constant dense<0.000000e+00> : vector<256x128xf32>
    %57 = tpu.matmul %54, %56, %cst_14 {dimension_numbers = #tpu.dot_dimension_numbers<[1], [0], [0], [1], [0, 0, 1, 1], [], []>} : vector<256x128xbf16>, vector<128x128xbf16>, vector<256x128xf32> -> vector<256x128xf32>
    %58 = arith.addf %51, %57 : vector<256x128xf32>
    %59 = vector.extract_strided_slice %0 {offsets = [0, 0, 2, 2, 0], sizes = [1, 1, 16, 16, 128], strides = [1, 1, 1, 1, 1]} : vector<1x1x18x18x128xbf16> to vector<1x1x16x16x128xbf16>
    %60 = vector.shape_cast %59 : vector<1x1x16x16x128xbf16> to vector<1x16x16x128xbf16>
    %61 = vector.shape_cast %60 : vector<1x16x16x128xbf16> to vector<256x128xbf16>
    %62 = vector.extract_strided_slice %1 {offsets = [8, 0, 0], sizes = [1, 128, 128], strides = [1, 1, 1]} : vector<9x128x128xbf16> to vector<1x128x128xbf16>
    %63 = vector.shape_cast %62 : vector<1x128x128xbf16> to vector<128x128xbf16>
    %cst_15 = arith.constant dense<0.000000e+00> : vector<256x128xf32>
    %64 = tpu.matmul %61, %63, %cst_15 {dimension_numbers = #tpu.dot_dimension_numbers<[1], [0], [0], [1], [0, 0, 1, 1], [], []>} : vector<256x128xbf16>, vector<128x128xbf16>, vector<256x128xf32> -> vector<256x128xf32>
    %65 = arith.addf %58, %64 : vector<256x128xf32>
    %66 = vector.shape_cast %65 : vector<256x128xf32> to vector<1x16x16x128xf32>
    %c0_16 = arith.constant 0 : index
    %c0_17 = arith.constant 0 : index
    %c0_18 = arith.constant 0 : index
    %c0_19 = arith.constant 0 : index
    %67 = vector.load %arg4[%c0_16, %c0_17, %c0_18, %c0_19] : memref<1x16x16x128xf32, #tpu.memory_space<vmem>>, vector<1x16x16x128xf32>
    tpu.vector_store %arg4[%c0_16, %c0_17, %c0_18, %c0_19], %66 {strides = array<i32>} : memref<1x16x16x128xf32, #tpu.memory_space<vmem>>, vector<1x16x16x128xf32>,
    %cst_20 = arith.constant dense<0.000000e+00> : vector<128xf32>
    %68 = vector.multi_reduction <add>, %65, %cst_20 [0] : vector<256x128xf32> to vector<128xf32>
    %69 = vector.shape_cast %68 : vector<128xf32> to vector<1x128xf32>
    %cst_21 = arith.constant 3.906250e-03 : f32
    %70 = vector.broadcast %cst_21 : f32 to vector<1x128xf32>
    %71 = arith.mulf %69, %70 : vector<1x128xf32>
    %72 = vector.broadcast %71 : vector<1x128xf32> to vector<256x128xf32>
    %73 = arith.subf %65, %72 : vector<256x128xf32>
    %74 = arith.mulf %73, %73 : vector<256x128xf32>
    %cst_22 = arith.constant dense<0.000000e+00> : vector<128xf32>
    %75 = vector.multi_reduction <add>, %74, %cst_22 [0] : vector<256x128xf32> to vector<128xf32>
    %76 = vector.shape_cast %75 : vector<128xf32> to vector<1x128xf32>
    %77 = tpu.concatenate %69, %76 in 0 : vector<1x128xf32>, vector<1x128xf32> -> vector<2x128xf32>
    %78 = vector.shape_cast %77 : vector<2x128xf32> to vector<1x1x2x128xf32>
    %c0_23 = arith.constant 0 : index
    %c0_24 = arith.constant 0 : index
    %c0_25 = arith.constant 0 : index
    %c0_26 = arith.constant 0 : index
    %79 = vector.load %arg5[%c0_23, %c0_24, %c0_25, %c0_26] : memref<1x1x2x128xf32, #tpu.memory_space<vmem>>, vector<1x1x2x128xf32>
    tpu.vector_store %arg5[%c0_23, %c0_24, %c0_25, %c0_26], %78 {strides = array<i32>} : memref<1x1x2x128xf32, #tpu.memory_space<vmem>>, vector<1x1x2x128xf32>,
    return
  }
  func.func @transform_0(%arg0: i32, %arg1: i32) -> (i32, i32, i32, i32, i32) {
    %c0_i32 = arith.constant 0 : i32
    %c0_i32_0 = arith.constant 0 : i32
    %c0_i32_1 = arith.constant 0 : i32
    %c0_i32_2 = arith.constant 0 : i32
    return %arg0, %arg1, %c0_i32, %c0_i32_0, %c0_i32_1 : i32, i32, i32, i32, i32
  }
  func.func @transform_1(%arg0: i32, %arg1: i32) -> (i32, i32, i32) {
    %c0_i32 = arith.constant 0 : i32
    %c0_i32_0 = arith.constant 0 : i32
    %c0_i32_1 = arith.constant 0 : i32
    %c0_i32_2 = arith.constant 0 : i32
    return %c0_i32, %c0_i32_0, %c0_i32_1 : i32, i32, i32
  }
  func.func @transform_2(%arg0: i32, %arg1: i32) -> (i32, i32, i32, i32) {
    %c0_i32 = arith.constant 0 : i32
    %c0_i32_0 = arith.constant 0 : i32
    %c0_i32_1 = arith.constant 0 : i32
    return %arg0, %arg1, %c0_i32, %c0_i32_0 : i32, i32, i32, i32
  }
  func.func @transform_3(%arg0: i32, %arg1: i32) -> (i32, i32, i32, i32) {
    %c0_i32 = arith.constant 0 : i32
    %c0_i32_0 = arith.constant 0 : i32
    %c0_i32_1 = arith.constant 0 : i32
    return %arg0, %arg1, %c0_i32, %c0_i32_0 : i32, i32, i32, i32
  }
}

module attributes {stable_mosaic.version = 11 : i64} {
  func.func @_bn_silu_res_kernel(%arg0: i32, %arg1: i32, %arg2: memref<1x16x16x128xf32, #tpu.memory_space<vmem>>, %arg3: memref<1x16x16x128xf32, #tpu.memory_space<vmem>>, %arg4: memref<1x128xf32, #tpu.memory_space<vmem>>, %arg5: memref<1x128xf32, #tpu.memory_space<vmem>>, %arg6: memref<1x16x16x128xf32, #tpu.memory_space<vmem>>) attributes {dimension_semantics = [#tpu.dimension_semantics<parallel>, #tpu.dimension_semantics<parallel>], iteration_bounds = array<i64: 2, 1>, scalar_prefetch = 0 : i64, scratch_operands = 0 : i64, tpu.core_type = #tpu.core_type<tc>, window_params = [{transform_indices = @transform_0, window_bounds = array<i64: 1, 16, 16, 128>}, {transform_indices = @transform_1, window_bounds = array<i64: 1, 16, 16, 128>}, {pipeline_mode = #tpu.pipeline_mode<synchronous>, transform_indices = @transform_2, window_bounds = array<i64: 1, 128>}, {pipeline_mode = #tpu.pipeline_mode<synchronous>, transform_indices = @transform_3, window_bounds = array<i64: 1, 128>}, {transform_indices = @transform_4, window_bounds = array<i64: 1, 16, 16, 128>}]} {
    %c0 = arith.constant 0 : index
    %c0_0 = arith.constant 0 : index
    %0 = vector.load %arg4[%c0, %c0_0] : memref<1x128xf32, #tpu.memory_space<vmem>>, vector<1x128xf32>
    %1 = vector.shape_cast %0 : vector<1x128xf32> to vector<1x1x1x128xf32>
    %c0_1 = arith.constant 0 : index
    %c0_2 = arith.constant 0 : index
    %2 = vector.load %arg5[%c0_1, %c0_2] : memref<1x128xf32, #tpu.memory_space<vmem>>, vector<1x128xf32>
    %3 = vector.shape_cast %2 : vector<1x128xf32> to vector<1x1x1x128xf32>
    %c0_3 = arith.constant 0 : index
    %c0_4 = arith.constant 0 : index
    %c0_5 = arith.constant 0 : index
    %c0_6 = arith.constant 0 : index
    %4 = vector.load %arg2[%c0_3, %c0_4, %c0_5, %c0_6] : memref<1x16x16x128xf32, #tpu.memory_space<vmem>>, vector<1x16x16x128xf32>
    %5 = vector.broadcast %1 : vector<1x1x1x128xf32> to vector<1x16x16x128xf32>
    %6 = arith.mulf %4, %5 : vector<1x16x16x128xf32>
    %7 = vector.broadcast %3 : vector<1x1x1x128xf32> to vector<1x16x16x128xf32>
    %8 = arith.addf %6, %7 : vector<1x16x16x128xf32>
    %cst = arith.constant 5.000000e-01 : f32
    %9 = vector.broadcast %cst : f32 to vector<1x16x16x128xf32>
    %10 = arith.mulf %9, %8 : vector<1x16x16x128xf32>
    %11 = math.tanh %10 : vector<1x16x16x128xf32>
    %cst_7 = arith.constant 5.000000e-01 : f32
    %12 = vector.broadcast %cst_7 : f32 to vector<1x16x16x128xf32>
    %13 = arith.mulf %12, %11 : vector<1x16x16x128xf32>
    %cst_8 = arith.constant 5.000000e-01 : f32
    %14 = vector.broadcast %cst_8 : f32 to vector<1x16x16x128xf32>
    %15 = arith.addf %13, %14 : vector<1x16x16x128xf32>
    %16 = arith.mulf %8, %15 : vector<1x16x16x128xf32>
    %c0_9 = arith.constant 0 : index
    %c0_10 = arith.constant 0 : index
    %c0_11 = arith.constant 0 : index
    %c0_12 = arith.constant 0 : index
    %17 = vector.load %arg3[%c0_9, %c0_10, %c0_11, %c0_12] : memref<1x16x16x128xf32, #tpu.memory_space<vmem>>, vector<1x16x16x128xf32>
    %18 = arith.addf %16, %17 : vector<1x16x16x128xf32>
    %c0_13 = arith.constant 0 : index
    %c0_14 = arith.constant 0 : index
    %c0_15 = arith.constant 0 : index
    %c0_16 = arith.constant 0 : index
    %19 = vector.load %arg6[%c0_13, %c0_14, %c0_15, %c0_16] : memref<1x16x16x128xf32, #tpu.memory_space<vmem>>, vector<1x16x16x128xf32>
    tpu.vector_store %arg6[%c0_13, %c0_14, %c0_15, %c0_16], %18 {strides = array<i32>} : memref<1x16x16x128xf32, #tpu.memory_space<vmem>>, vector<1x16x16x128xf32>,
    return
  }
  func.func @transform_0(%arg0: i32, %arg1: i32) -> (i32, i32, i32, i32) {
    %c0_i32 = arith.constant 0 : i32
    %c0_i32_0 = arith.constant 0 : i32
    %c0_i32_1 = arith.constant 0 : i32
    return %arg0, %arg1, %c0_i32, %c0_i32_0 : i32, i32, i32, i32
  }
  func.func @transform_1(%arg0: i32, %arg1: i32) -> (i32, i32, i32, i32) {
    %c0_i32 = arith.constant 0 : i32
    %c0_i32_0 = arith.constant 0 : i32
    %c0_i32_1 = arith.constant 0 : i32
    return %arg0, %arg1, %c0_i32, %c0_i32_0 : i32, i32, i32, i32
  }
  func.func @transform_2(%arg0: i32, %arg1: i32) -> (i32, i32) {
    %c0_i32 = arith.constant 0 : i32
    %c0_i32_0 = arith.constant 0 : i32
    %c0_i32_1 = arith.constant 0 : i32
    return %c0_i32, %c0_i32_0 : i32, i32
  }
  func.func @transform_3(%arg0: i32, %arg1: i32) -> (i32, i32) {
    %c0_i32 = arith.constant 0 : i32
    %c0_i32_0 = arith.constant 0 : i32
    %c0_i32_1 = arith.constant 0 : i32
    return %c0_i32, %c0_i32_0 : i32, i32
  }
  func.func @transform_4(%arg0: i32, %arg1: i32) -> (i32, i32, i32, i32) {
    %c0_i32 = arith.constant 0 : i32
    %c0_i32_0 = arith.constant 0 : i32
    %c0_i32_1 = arith.constant 0 : i32
    return %arg0, %arg1, %c0_i32, %c0_i32_0 : i32, i32, i32, i32
  }
}

</mosaic_0001>

<bundles_post_ra>
// kernel: conv_bn_silu.3
= control target key start
LH: loop header
LB: loop body
LE: loop exit
PB: predicated region body
PF: predicated region fallthrough
CT: control target
= control target key end

     0   :  { %s919_s15 = smov 0   ;;  %s921_s16 = smov 0   ;;  %s1267_s0 = inlined_call_operand.vmem [shape: f32[2,16,16,128], index: 0, kind: input, shape index: {}]   ;;  %s1268_s1 = inlined_call_operand.vmem [shape: f32[2,16,16,128], index: 1, kind: input, shape index: {}]   ;;  %s1269_s2 = inlined_call_operand.vmem [shape: f32[1,128], index: 2, kind: input, shape index: {}]   ;;  %s1270_s3 = inlined_call_operand.vmem [shape: f32[1,128], index: 3, kind: input, shape index: {}]   ;;  %s1271_s4 = inlined_call_operand.vmem [shape: f32[2,16,16,128], index: 4, kind: output, shape index: {}]  }
   0x1   :  { %s923_s17 = smov 0  }
   0x2 LB: > { %s26_s18 = sadd.s32 1, %s888_s16  ;;  %p768_p0 = scmp.ge.s32.totalorder %s892_s17, 1  ;;  %s892_s17 = sphi %s923_s17, %s14_s17   ;;  %s888_s16 = sphi %s921_s16, %s1273_s16   ;;  %s884_s15 = sphi %s919_s15, %s1272_s15  }
   0x3   : > { %p28_p1 = scmp.ge.s32.totalorder %s26_s18, 2  ;;  %p202_p2 = scmp.lt.s32.totalorder %s892_s17, 3 }
   0x5   : > { %s1275_s18 = smov (%p28_p1, %s26_s18), 0  ;;  %p203_p3 = pnand %p768_p0, %p202_p2 }
   0x6   : > { %p249_p4 = scmp.lt.s32.totalorder (!%p203_p3), %s884_s15, 1  ;;  %v942_v0 = vld [vmem:[%s1269_s2] ss:$0 sm:$0xff] (!%p203_p3) }
   0x7   : > { %206 = sbr.rel (%p203_p3) target bundleno = 92 (0x5c), region = 36  ;;  %v953_v1 = vld [vmem:[%s1270_s3] ss:$0 sm:$0xff] (!%p203_p3) }
   0xe   : > { %s1277_s15 = smov (!%p249_p4, %s884_s15), 1 }
   0xf   : > { %s937_s19 = sshll.u32 %s1277_s15, 8 }
  0x10   : > { %s948_s24 = scalar_lea.vmem %s1267_s0, %s937_s19  ;;  %s1062_s29 = scalar_lea.vmem %s1268_s1, %s937_s19 }
  0x11   : > { %v283_v2 = vld [vmem:[%s948_s24] sm:$0xff]  ;;  %v284_v3 = vld [vmem:[%s948_s24 + $0x8] sm:$0xff]  ;;  %v285_v6 = vld [vmem:[%s948_s24 + $0x10] sm:$0xff]  ;;  %s1083_s6 = scalar_lea.vmem %s1271_s4, %s937_s19 }
  0x12   : > { %v321_v4 = vmul.f32 %v942_v0, %v283_v2  ;;  %v322_v5 = vmul.f32 %v942_v0, %v284_v3  ;;  %v323_v7 = vmul.f32 %v942_v0, %v285_v6  ;;  %v286_v8 = vld [vmem:[%s948_s24 + $0x18] sm:$0xff]  ;;  %v287_v9 = vld [vmem:[%s948_s24 + $0x20] sm:$0xff]  ;;  %v288_v14 = vld [vmem:[%s948_s24 + $0x28] sm:$0xff] }
  0x13   : > { %v324_v12 = vmul.f32 %v942_v0, %v286_v8  ;;  %v325_v13 = vmul.f32 %v942_v0, %v287_v9  ;;  %v326_v16 = vmul.f32 %v942_v0, %v288_v14  ;;  %v289_v17 = vld [vmem:[%s948_s24 + $0x30] sm:$0xff]  ;;  %v290_v18 = vld [vmem:[%s948_s24 + $0x38] sm:$0xff]  ;;  %v291_v23 = vld [vmem:[%s948_s24 + $0x40] sm:$0xff] }
  0x14   : > { %v964_v10 = vadd.f32 %v953_v1, %v321_v4  ;;  %v967_v11 = vadd.f32 %v953_v1, %v322_v5  ;;  %v973_v15 = vadd.f32 %v953_v1, %v323_v7  ;;  %v327_v26 = vmul.f32 %v942_v0, %v289_v17  ;;  %v292_v28 = vld [vmem:[%s948_s24 + $0x48] sm:$0xff]  ;;  %v293_v29 = vld [vmem:[%s948_s24 + $0x50] sm:$0xff]  ;;  %v294_v33 = vld [vmem:[%s948_s24 + $0x58] sm:$0xff] }
  0x15   : > { %v981_v21 = vadd.f32 %v953_v1, %v324_v12  ;;  %v984_v22 = vadd.f32 %v953_v1, %v325_v13  ;;  %v989_v25 = vadd.f32 %v953_v1, %v326_v16  ;;  %v328_v27 = vmul.f32 %v942_v0, %v290_v18  ;;  %v295_v40 = vld [vmem:[%s948_s24 + $0x60] sm:$0xff]  ;;  %v296_v41 = vld [vmem:[%s948_s24 + $0x68] sm:$0xff]  ;;  %v297_v45 = vld [vmem:[%s948_s24 + $0x70] sm:$0xff] }
  0x16   : > { %v391_v19 = vmul.f32 0.5, %v964_v10  ;;  %v392_v20 = vmul.f32 0.5, %v967_v11  ;;  %v393_v24 = vmul.f32 0.5, %v973_v15  ;;  %v329_v32 = vmul.f32 %v942_v0, %v291_v23  ;;  %v298_v52 = vld [vmem:[%s948_s24 + $0x78] sm:$0xff]  ;;  %v299_v53 = vld [vmem:[%s948_s24 + $0x80] sm:$0xff]  ;;  %v300_v57 = vld [vmem:[%s948_s24 + $0x88] sm:$0xff] }
  0x17   : > { %v394_v30 = vmul.f32 0.5, %v981_v21  ;;  %v395_v31 = vmul.f32 0.5, %v984_v22  ;;  %v396_v34 = vmul.f32 0.5, %v989_v25  ;;  %v1001_v35 = vadd.f32 %v953_v1, %v327_v26  ;;  %v301_v2 = vld [vmem:[%s948_s24 + $0x90] sm:$0xff] }
  0x18   : > { %806 = vtanh.f32 %v391_v19  ;;  %v1004_v36 = vadd.f32 %v953_v1, %v328_v27  ;;  %v1007_v37 = vadd.f32 %v953_v1, %v329_v32  ;;  %v330_v38 = vmul.f32 %v942_v0, %v292_v28 }
  0x19   : > { %808 = vtanh.f32 %v392_v20  ;;  %v331_v39 = vmul.f32 %v942_v0, %v293_v29  ;;  %v397_v42 = vmul.f32 0.5, %v1001_v35  ;;  %v332_v44 = vmul.f32 %v942_v0, %v294_v33  ;;  %v551_v29 = vld [vmem:[%s1062_s29] sm:$0xff] }
  0x1a   : > { %810 = vtanh.f32 %v393_v24  ;;  %v398_v43 = vmul.f32 0.5, %v1004_v36  ;;  %v399_v46 = vmul.f32 0.5, %v1007_v37  ;;  %v1019_v47 = vadd.f32 %v953_v1, %v330_v38  ;;  %v552_v38 = vld [vmem:[%s1062_s29 + $0x8] sm:$0xff] }
  0x1b   : > { %812 = vtanh.f32 %v394_v30  ;;  %v1022_v48 = vadd.f32 %v953_v1, %v331_v39  ;;  %v1025_v49 = vadd.f32 %v953_v1, %v332_v44  ;;  %v333_v50 = vmul.f32 %v942_v0, %v295_v40 }
  0x1c   : > { %814 = vtanh.f32 %v395_v31  ;;  %v334_v51 = vmul.f32 %v942_v0, %v296_v41  ;;  %v400_v54 = vmul.f32 0.5, %v1019_v47  ;;  %v335_v56 = vmul.f32 %v942_v0, %v297_v45 }
  0x1d   : > { %816 = vtanh.f32 %v396_v34  ;;  %v401_v55 = vmul.f32 0.5, %v1022_v48  ;;  %v402_v58 = vmul.f32 0.5, %v1025_v49  ;;  %v1037_v59 = vadd.f32 %v953_v1, %v333_v50 }
  0x1e   : > { %818 = vtanh.f32 %v397_v42  ;;  %v1040_v60 = vadd.f32 %v953_v1, %v334_v51  ;;  %v1043_v61 = vadd.f32 %v953_v1, %v335_v56  ;;  %v336_v62 = vmul.f32 %v942_v0, %v298_v52  ;;  %v554_v51 = vld [vmem:[%s1062_s29 + $0x18] sm:$0xff] }
  0x1f   : > { %820 = vtanh.f32 %v398_v43  ;;  %v337_v63 = vmul.f32 %v942_v0, %v299_v53  ;;  %v403_v3 = vmul.f32 0.5, %v1037_v59  ;;  %v338_v5 = vmul.f32 %v942_v0, %v300_v57  ;;  %v553_v43 = vld [vmem:[%s1062_s29 + $0x10] sm:$0xff] }
  0x20   : > { %822 = vtanh.f32 %v399_v46  ;;  %v404_v4 = vmul.f32 0.5, %v1040_v60  ;;  %v405_v7 = vmul.f32 0.5, %v1043_v61  ;;  %v1053_v8 = vadd.f32 %v953_v1, %v336_v62 }
  0x21   : > { %824 = vtanh.f32 %v400_v54  ;;  %v1056_v9 = vadd.f32 %v953_v1, %v337_v63  ;;  %v1065_v14 = vadd.f32 %v953_v1, %v338_v5  ;;  %v339_v16 = vmul.f32 %v942_v0, %v301_v2 }
  0x22   : > { %v807_v6 = vpop.eup %806  ;;  %826 = vtanh.f32 %v401_v55  ;;  %v406_v19 = vmul.f32 0.5, %v1053_v8 }
  0x23   : > { %v809_v12 = vpop.eup %808  ;;  %v455_v13 = vmul.f32 0.5, %v807_v6  ;;  %828 = vtanh.f32 %v402_v58  ;;  %v407_v20 = vmul.f32 0.5, %v1056_v9  ;;  %v1071_v27 = vmul.f32 0.5, %v1065_v14 }
  0x24   : > { %v811_v17 = vpop.eup %810  ;;  %v456_v18 = vmul.f32 0.5, %v809_v12  ;;  %830 = vtanh.f32 %v403_v3  ;;  %v1075_v32 = vadd.f32 %v953_v1, %v339_v16 }
  0x25   : > { %v813_v23 = vpop.eup %812  ;;  %v487_v24 = vadd.f32 0.5, %v455_v13  ;;  %v457_v26 = vmul.f32 0.5, %v811_v17  ;;  %832 = vtanh.f32 %v404_v4 }
  0x26   : > { %v815_v28 = vpop.eup %814  ;;  %v488_v30 = vadd.f32 0.5, %v456_v18  ;;  %v458_v31 = vmul.f32 0.5, %v813_v23  ;;  %834 = vtanh.f32 %v405_v7  ;;  %v557_v7 = vld [vmem:[%s1062_s29 + $0x30] sm:$0xff]  ;;  %v558_v18 = vld [vmem:[%s1062_s29 + $0x38] sm:$0xff] }
  0x27   : > { %v817_v33 = vpop.eup %816  ;;  %v519_v34 = vmul.f32 %v487_v24, %v964_v10  ;;  %v489_v39 = vadd.f32 0.5, %v457_v26  ;;  %v459_v40 = vmul.f32 0.5, %v815_v28  ;;  %836 = vtanh.f32 %v406_v19  ;;  %v559_v26 = vld [vmem:[%s1062_s29 + $0x40] sm:$0xff] }
  0x28   : > { %v819_v41 = vpop.eup %818  ;;  %v520_v42 = vmul.f32 %v488_v30, %v967_v11  ;;  %v490_v44 = vadd.f32 0.5, %v458_v31  ;;  %v460_v45 = vmul.f32 0.5, %v817_v33  ;;  %838 = vtanh.f32 %v407_v20  ;;  %v555_v11 = vld [vmem:[%s1062_s29 + $0x20] sm:$0xff]  ;;  %v560_v33 = vld [vmem:[%s1062_s29 + $0x48] sm:$0xff] }
  0x29   : > { %v821_v46 = vpop.eup %820  ;;  %v583_v10 = vadd.f32 %v551_v29, %v519_v34  ;;  %v521_v50 = vmul.f32 %v489_v39, %v973_v15  ;;  %v491_v52 = vadd.f32 0.5, %v459_v40  ;;  %v461_v53 = vmul.f32 0.5, %v819_v41  ;;  %v556_v15 = vld [vmem:[%s1062_s29 + $0x28] sm:$0xff]  ;;  %v561_v41 = vld [vmem:[%s1062_s29 + $0x50] sm:$0xff] }
  0x2a   : > { %v823_v54 = vpop.eup %822  ;;  %v584_v55 = vadd.f32 %v552_v38, %v520_v42  ;;  %v522_v56 = vmul.f32 %v490_v44, %v981_v21  ;;  %v492_v57 = vadd.f32 0.5, %v460_v45  ;;  %v462_v58 = vmul.f32 0.5, %v821_v46  ;;  %v562_v46 = vld [vmem:[%s1062_s29 + $0x58] sm:$0xff] }
  0x2b   : > { %v825_v62 = vpop.eup %824  ;;  %615 = vst [vmem:[%s1083_s6] sm:$0xff] %v583_v10  ;;  %v585_v63 = vadd.f32 %v553_v43, %v521_v50  ;;  %v523_v2 = vmul.f32 %v491_v52, %v984_v22  ;;  %v493_v3 = vadd.f32 0.5, %v461_v53  ;;  %v463_v4 = vmul.f32 0.5, %v823_v54  ;;  %v563_v53 = vld [vmem:[%s1062_s29 + $0x60] sm:$0xff] }
  0x2c   : > { %v827_v5 = vpop.eup %826  ;;  %616 = vst [vmem:[%s1083_s6 + $0x8] sm:$0xff] %v584_v55  ;;  %v586_v6 = vadd.f32 %v554_v51, %v522_v56  ;;  %v524_v21 = vmul.f32 %v492_v57, %v989_v25  ;;  %v494_v12 = vadd.f32 0.5, %v462_v58  ;;  %v464_v13 = vmul.f32 0.5, %v825_v62  ;;  %v302_v62 = vld [vmem:[%s948_s24 + $0x98] sm:$0xff] }
  0x2d   : > { %v829_v16 = vpop.eup %828  ;;  %617 = vst [vmem:[%s1083_s6 + $0x10] sm:$0xff] %v585_v63  ;;  %v587_v17 = vadd.f32 %v555_v11, %v523_v2  ;;  %v525_v22 = vmul.f32 %v493_v3, %v1001_v35  ;;  %v495_v19 = vadd.f32 0.5, %v463_v4  ;;  %v465_v20 = vmul.f32 0.5, %v827_v5  ;;  %v564_v11 = vld [vmem:[%s1062_s29 + $0x68] sm:$0xff]  ;;  %v303_v63 = vld [vmem:[%s948_s24 + $0xa0] sm:$0xff] }
  0x2e   : > { %v831_v23 = vpop.eup %830  ;;  %618 = vst [vmem:[%s1083_s6 + $0x18] sm:$0xff] %v586_v6  ;;  %v588_v24 = vadd.f32 %v556_v15, %v524_v21  ;;  %v526_v25 = vmul.f32 %v494_v12, %v1004_v36  ;;  %v496_v28 = vadd.f32 0.5, %v464_v13  ;;  %v466_v29 = vmul.f32 0.5, %v829_v16  ;;  %v565_v15 = vld [vmem:[%s1062_s29 + $0x70] sm:$0xff]  ;;  %v566_v6 = vld [vmem:[%s1062_s29 + $0x78] sm:$0xff]  ;;  %v567_v16 = vld [vmem:[%s1062_s29 + $0x80] sm:$0xff] }
  0x2f   : > { %v833_v30 = vpop.eup %832  ;;  %619 = vst [vmem:[%s1083_s6 + $0x20] sm:$0xff] %v587_v17  ;;  %v589_v31 = vadd.f32 %v557_v7, %v525_v22  ;;  %v527_v35 = vmul.f32 %v495_v19, %v1007_v37  ;;  %v497_v34 = vadd.f32 0.5, %v465_v20  ;;  %v467_v38 = vmul.f32 0.5, %v831_v23  ;;  %v305_v12 = vld [vmem:[%s948_s24 + $0xb0] sm:$0xff]  ;;  %v306_v22 = vld [vmem:[%s948_s24 + $0xb8] sm:$0xff]  ;;  %v308_v23 = vld [vmem:[%s948_s24 + $0xc8] sm:$0xff] }
  0x30   : > { %v835_v39 = vpop.eup %834  ;;  %620 = vst [vmem:[%s1083_s6 + $0x28] sm:$0xff] %v588_v24  ;;  %v590_v40 = vadd.f32 %v558_v18, %v526_v25  ;;  %v528_v36 = vmul.f32 %v496_v28, %v1019_v47  ;;  %v498_v42 = vadd.f32 0.5, %v466_v29  ;;  %v468_v43 = vmul.f32 0.5, %v833_v30  ;;  %v309_v28 = vld [vmem:[%s948_s24 + $0xd0] sm:$0xff] }
  0x31   : > { %v837_v44 = vpop.eup %836  ;;  %621 = vst [vmem:[%s1083_s6 + $0x30] sm:$0xff] %v589_v31  ;;  %v591_v45 = vadd.f32 %v559_v26, %v527_v35  ;;  %v529_v37 = vmul.f32 %v497_v34, %v1022_v48  ;;  %v499_v10 = vadd.f32 0.5, %v467_v38  ;;  %v469_v50 = vmul.f32 0.5, %v835_v39  ;;  %v310_v35 = vld [vmem:[%s948_s24 + $0xd8] sm:$0xff] }
  0x32   : > { %v839_v51 = vpop.eup %838  ;;  %622 = vst [vmem:[%s1083_s6 + $0x38] sm:$0xff] %v590_v40  ;;  %v592_v52 = vadd.f32 %v560_v33, %v528_v36  ;;  %v530_v47 = vmul.f32 %v498_v42, %v1025_v49  ;;  %v500_v54 = vadd.f32 0.5, %v468_v43  ;;  %v470_v55 = vmul.f32 0.5, %v837_v44  ;;  %v311_v43 = vld [vmem:[%s948_s24 + $0xe0] sm:$0xff] }
  0x33   : > { %623 = vst [vmem:[%s1083_s6 + $0x40] sm:$0xff] %v591_v45  ;;  %v593_v56 = vadd.f32 %v561_v41, %v529_v37  ;;  %v531_v48 = vmul.f32 %v499_v10, %v1037_v59  ;;  %v501_v57 = vadd.f32 0.5, %v469_v50  ;;  %v471_v58 = vmul.f32 0.5, %v839_v51  ;;  %v304_v59 = vld [vmem:[%s948_s24 + $0xa8] sm:$0xff] }
  0x34   : > { %624 = vst [vmem:[%s1083_s6 + $0x48] sm:$0xff] %v592_v52  ;;  %v594_v2 = vadd.f32 %v562_v46, %v530_v47  ;;  %v532_v49 = vmul.f32 %v500_v54, %v1040_v60  ;;  %v502_v3 = vadd.f32 0.5, %v470_v55  ;;  %840 = vtanh.f32 %v1071_v27  ;;  %v312_v46 = vld [vmem:[%s948_s24 + $0xe8] sm:$0xff]  ;;  %v313_v52 = vld [vmem:[%s948_s24 + $0xf0] sm:$0xff] }
  0x35   : > { %625 = vst [vmem:[%s1083_s6 + $0x50] sm:$0xff] %v593_v56  ;;  %v595_v4 = vadd.f32 %v563_v53, %v531_v48  ;;  %v533_v5 = vmul.f32 %v501_v57, %v1043_v61  ;;  %v503_v21 = vadd.f32 0.5, %v471_v58  ;;  %v409_v7 = vmul.f32 0.5, %v1075_v32  ;;  %v307_v61 = vld [vmem:[%s948_s24 + $0xc0] sm:$0xff]  ;;  %v314_v56 = vld [vmem:[%s948_s24 + $0xf8] sm:$0xff] }
  0x36   : > { %626 = vst [vmem:[%s1083_s6 + $0x58] sm:$0xff] %v594_v2  ;;  %v596_v60 = vadd.f32 %v564_v11, %v532_v49  ;;  %v534_v13 = vmul.f32 %v502_v3, %v1053_v8  ;;  %v340_v27 = vmul.f32 %v942_v0, %v302_v62  ;;  %v341_v17 = vmul.f32 %v942_v0, %v303_v63 }
  0x37   : > { %627 = vst [vmem:[%s1083_s6 + $0x60] sm:$0xff] %v595_v4  ;;  %v597_v18 = vadd.f32 %v565_v15, %v533_v5  ;;  %v535_v19 = vmul.f32 %v503_v21, %v1056_v9  ;;  %842 = vtanh.f32 %v409_v7  ;;  %v342_v20 = vmul.f32 %v942_v0, %v304_v59  ;;  %v568_v59 = vld [vmem:[%s1062_s29 + $0x88] sm:$0xff] }
  0x38   : > { %628 = vst [vmem:[%s1083_s6 + $0x68] sm:$0xff] %v596_v60  ;;  %v598_v8 = vadd.f32 %v566_v6, %v534_v13  ;;  %v1143_v24 = vadd.f32 %v953_v1, %v340_v27  ;;  %v1146_v25 = vadd.f32 %v953_v1, %v341_v17  ;;  %v343_v26 = vmul.f32 %v942_v0, %v305_v12 }
  0x39   : > { %629 = vst [vmem:[%s1083_s6 + $0x70] sm:$0xff] %v597_v18  ;;  %v599_v9 = vadd.f32 %v567_v16, %v535_v19  ;;  %v1152_v29 = vadd.f32 %v953_v1, %v342_v20  ;;  %v344_v30 = vmul.f32 %v942_v0, %v306_v22  ;;  %v345_v31 = vmul.f32 %v942_v0, %v307_v61  ;;  %v569_v16 = vld [vmem:[%s1062_s29 + $0x90] sm:$0xff] }
  0x3a   : > { %630 = vst [vmem:[%s1083_s6 + $0x78] sm:$0xff] %v598_v8  ;;  %v410_v33 = vmul.f32 0.5, %v1143_v24  ;;  %v411_v34 = vmul.f32 0.5, %v1146_v25  ;;  %v1161_v38 = vadd.f32 %v953_v1, %v343_v26  ;;  %v346_v39 = vmul.f32 %v942_v0, %v308_v23 }
  0x3b   : > { %631 = vst [vmem:[%s1083_s6 + $0x80] sm:$0xff] %v599_v9  ;;  %v412_v40 = vmul.f32 0.5, %v1152_v29  ;;  %v1167_v36 = vadd.f32 %v953_v1, %v344_v30  ;;  %v1170_v41 = vadd.f32 %v953_v1, %v345_v31  ;;  %v347_v42 = vmul.f32 %v942_v0, %v309_v28  ;;  %v570_v28 = vld [vmem:[%s1062_s29 + $0x98] sm:$0xff] }
  0x3c   : > { %844 = vtanh.f32 %v410_v33  ;;  %v413_v44 = vmul.f32 0.5, %v1161_v38  ;;  %v1176_v45 = vadd.f32 %v953_v1, %v346_v39  ;;  %v348_v37 = vmul.f32 %v942_v0, %v310_v35  ;;  %v571_v35 = vld [vmem:[%s1062_s29 + $0xa0] sm:$0xff] }
  0x3d   : > { %846 = vtanh.f32 %v411_v34  ;;  %v414_v10 = vmul.f32 0.5, %v1167_v36  ;;  %v415_v50 = vmul.f32 0.5, %v1170_v41  ;;  %v1183_v51 = vadd.f32 %v953_v1, %v347_v42  ;;  %v572_v42 = vld [vmem:[%s1062_s29 + $0xa8] sm:$0xff] }
  0x3e   : > { %v841_v47 = vpop.eup %840  ;;  %848 = vtanh.f32 %v412_v40  ;;  %v416_v53 = vmul.f32 0.5, %v1176_v45  ;;  %v1188_v54 = vadd.f32 %v953_v1, %v348_v37  ;;  %v349_v55 = vmul.f32 %v942_v0, %v311_v43 }
  0x3f   : > { %v472_v48 = vmul.f32 0.5, %v841_v47  ;;  %850 = vtanh.f32 %v413_v44  ;;  %v417_v11 = vmul.f32 0.5, %v1183_v51  ;;  %v350_v57 = vmul.f32 %v942_v0, %v312_v46 }
  0x40   : > { %852 = vtanh.f32 %v414_v10  ;;  %v418_v58 = vmul.f32 0.5, %v1188_v54  ;;  %v1196_v62 = vadd.f32 %v953_v1, %v349_v55  ;;  %v351_v63 = vmul.f32 %v942_v0, %v313_v52 }
  0x41   : > { %v843_v2 = vpop.eup %842  ;;  %v504_v49 = vadd.f32 0.5, %v472_v48  ;;  %854 = vtanh.f32 %v415_v50  ;;  %v1200_v15 = vadd.f32 %v953_v1, %v350_v57  ;;  %v352_v3 = vmul.f32 %v942_v0, %v314_v56  ;;  %v573_v50 = vld [vmem:[%s1062_s29 + $0xb0] sm:$0xff]  ;;  %v574_v56 = vld [vmem:[%s1062_s29 + $0xb8] sm:$0xff] }
  0x42   : > { %v473_v4 = vmul.f32 0.5, %v843_v2  ;;  %856 = vtanh.f32 %v416_v53  ;;  %v419_v5 = vmul.f32 0.5, %v1196_v62  ;;  %v1206_v6 = vadd.f32 %v953_v1, %v351_v63 }
  0x43   : > { %v536_v21 = vmul.f32 %v504_v49, %v1065_v14  ;;  %858 = vtanh.f32 %v417_v11  ;;  %v420_v7 = vmul.f32 0.5, %v1200_v15  ;;  %v1211_v12 = vadd.f32 %v953_v1, %v352_v3 }
  0x44   : > { %v505_v60 = vadd.f32 0.5, %v473_v4  ;;  %860 = vtanh.f32 %v418_v58  ;;  %v421_v0 = vmul.f32 0.5, %v1206_v6 }
  0x45   : > { %v600_v13 = vadd.f32 %v568_v59, %v536_v21  ;;  %862 = vtanh.f32 %v419_v5  ;;  %v422_v27 = vmul.f32 0.5, %v1211_v12  ;;  %v576_v59 = vld [vmem:[%s1062_s29 + $0xc8] sm:$0xff] }
  0x46   : > { %v845_v17 = vpop.eup %844  ;;  %v537_v14 = vmul.f32 %v505_v60, %v1075_v32  ;;  %864 = vtanh.f32 %v420_v7  ;;  %v577_v60 = vld [vmem:[%s1062_s29 + $0xd0] sm:$0xff] }
  0x47   : > { %v847_v22 = vpop.eup %846  ;;  %632 = vst [vmem:[%s1083_s6 + $0x88] sm:$0xff] %v600_v13  ;;  %v474_v61 = vmul.f32 0.5, %v845_v17  ;;  %866 = vtanh.f32 %v421_v0  ;;  %v578_v17 = vld [vmem:[%s1062_s29 + $0xd8] sm:$0xff] }
  0x48   : > { %v849_v1 = vpop.eup %848  ;;  %v601_v18 = vadd.f32 %v569_v16, %v537_v14  ;;  %v475_v19 = vmul.f32 0.5, %v847_v22  ;;  %868 = vtanh.f32 %v422_v27 }
  0x49   : > { %v851_v20 = vpop.eup %850  ;;  %v506_v23 = vadd.f32 0.5, %v474_v61  ;;  %v476_v8 = vmul.f32 0.5, %v849_v1  ;;  %v579_v1 = vld [vmem:[%s1062_s29 + $0xe0] sm:$0xff] }
  0x4a   : > { %v853_v26 = vpop.eup %852  ;;  %633 = vst [vmem:[%s1083_s6 + $0x90] sm:$0xff] %v601_v18  ;;  %v507_v9 = vadd.f32 0.5, %v475_v19  ;;  %v477_v32 = vmul.f32 0.5, %v851_v20 }
  0x4b   : > { %v855_v30 = vpop.eup %854  ;;  %v538_v31 = vmul.f32 %v506_v23, %v1143_v24  ;;  %v508_v33 = vadd.f32 0.5, %v476_v8  ;;  %v478_v34 = vmul.f32 0.5, %v853_v26 }
  0x4c   : > { %v857_v39 = vpop.eup %856  ;;  %v539_v40 = vmul.f32 %v507_v9, %v1146_v25  ;;  %v509_v43 = vadd.f32 0.5, %v477_v32  ;;  %v479_v44 = vmul.f32 0.5, %v855_v30 }
  0x4d   : > { %v859_v37 = vpop.eup %858  ;;  %v602_v46 = vadd.f32 %v570_v28, %v538_v31  ;;  %v540_v10 = vmul.f32 %v508_v33, %v1152_v29  ;;  %v510_v52 = vadd.f32 0.5, %v478_v34  ;;  %v480_v24 = vmul.f32 0.5, %v857_v39  ;;  %v575_v29 = vld [vmem:[%s1062_s29 + $0xc0] sm:$0xff]  ;;  %v582_v31 = vld [vmem:[%s1062_s29 + $0xf8] sm:$0xff] }
  0x4e   : > { %v861_v47 = vpop.eup %860  ;;  %v603_v53 = vadd.f32 %v571_v35, %v539_v40  ;;  %v541_v55 = vmul.f32 %v509_v43, %v1161_v38  ;;  %v511_v25 = vadd.f32 0.5, %v479_v44  ;;  %v481_v48 = vmul.f32 0.5, %v859_v37 }
  0x4f   : > { %v863_v11 = vpop.eup %862  ;;  %634 = vst [vmem:[%s1083_s6 + $0x98] sm:$0xff] %v602_v46  ;;  %v604_v57 = vadd.f32 %v572_v42, %v540_v10  ;;  %v542_v58 = vmul.f32 %v510_v52, %v1167_v36  ;;  %v512_v63 = vadd.f32 0.5, %v480_v24  ;;  %v482_v2 = vmul.f32 0.5, %v861_v47 }
  0x50   : > { %v865_v49 = vpop.eup %864  ;;  %635 = vst [vmem:[%s1083_s6 + $0xa0] sm:$0xff] %v603_v53  ;;  %v605_v3 = vadd.f32 %v573_v50, %v541_v55  ;;  %v543_v38 = vmul.f32 %v511_v25, %v1170_v41  ;;  %v513_v4 = vadd.f32 0.5, %v481_v48  ;;  %v483_v5 = vmul.f32 0.5, %v863_v11 }
  0x51   : > { %v867_v21 = vpop.eup %866  ;;  %636 = vst [vmem:[%s1083_s6 + $0xa8] sm:$0xff] %v604_v57  ;;  %v606_v7 = vadd.f32 %v574_v56, %v542_v58  ;;  %v544_v36 = vmul.f32 %v512_v63, %v1176_v45  ;;  %v514_v0 = vadd.f32 0.5, %v482_v2  ;;  %v484_v13 = vmul.f32 0.5, %v865_v49 }
  0x52   : > { %v869_v16 = vpop.eup %868  ;;  %637 = vst [vmem:[%s1083_s6 + $0xb0] sm:$0xff] %v605_v3  ;;  %v607_v27 = vadd.f32 %v575_v29, %v543_v38  ;;  %v545_v41 = vmul.f32 %v513_v4, %v1183_v51  ;;  %v515_v14 = vadd.f32 0.5, %v483_v5  ;;  %v485_v22 = vmul.f32 0.5, %v867_v21  ;;  %v580_v51 = vld [vmem:[%s1062_s29 + $0xe8] sm:$0xff] }
  0x53   : > { %638 = vst [vmem:[%s1083_s6 + $0xb8] sm:$0xff] %v606_v7  ;;  %v608_v61 = vadd.f32 %v576_v59, %v544_v36  ;;  %v546_v45 = vmul.f32 %v514_v0, %v1188_v54  ;;  %v516_v18 = vadd.f32 0.5, %v484_v13  ;;  %v486_v19 = vmul.f32 0.5, %v869_v16  ;;  %v581_v54 = vld [vmem:[%s1062_s29 + $0xf0] sm:$0xff] }
  0x54   : > { %639 = vst [vmem:[%s1083_s6 + $0xc0] sm:$0xff] %v607_v27  ;;  %v609_v20 = vadd.f32 %v577_v60, %v545_v41  ;;  %v547_v23 = vmul.f32 %v515_v14, %v1196_v62  ;;  %v517_v8 = vadd.f32 0.5, %v485_v22 }
  0x55   : > { %640 = vst [vmem:[%s1083_s6 + $0xc8] sm:$0xff] %v608_v61  ;;  %v610_v26 = vadd.f32 %v578_v17, %v546_v45  ;;  %v548_v28 = vmul.f32 %v516_v18, %v1200_v15  ;;  %v518_v9 = vadd.f32 0.5, %v486_v19 }
  0x56   : > { %641 = vst [vmem:[%s1083_s6 + $0xd0] sm:$0xff] %v609_v20  ;;  %v611_v32 = vadd.f32 %v579_v1, %v547_v23  ;;  %v549_v30 = vmul.f32 %v517_v8, %v1206_v6 }
  0x57   : > { %642 = vst [vmem:[%s1083_s6 + $0xd8] sm:$0xff] %v610_v26  ;;  %v612_v35 = vadd.f32 %v580_v51, %v548_v28  ;;  %v550_v62 = vmul.f32 %v518_v9, %v1211_v12 }
  0x58   : > { %643 = vst [vmem:[%s1083_s6 + $0xe0] sm:$0xff] %v611_v32  ;;  %v613_v33 = vadd.f32 %v581_v54, %v549_v30 }
  0x59   : > { %644 = vst [vmem:[%s1083_s6 + $0xe8] sm:$0xff] %v612_v35  ;;  %v614_v34 = vadd.f32 %v582_v31, %v550_v62 }
  0x5a   : > { %645 = vst [vmem:[%s1083_s6 + $0xf0] sm:$0xff] %v613_v33 }
  0x5b   : > { %646 = vst [vmem:[%s1083_s6 + $0xf8] sm:$0xff] %v614_v34 }
  0x5c PF: > { %s14_s17 = sadd.s32 1, %s892_s17   ;;  %s1272_s15 = smov %s888_s16 }
  0x5d   : > { %p11_p5 = scmp.ge.s32.totalorder %s14_s17, 4   ;;  %s1273_s16 = smov %s1275_s18 }
  0x5f   :  { %13 = sbr.rel (!%p11_p5) target bundleno = 2 (0x2), region = 69 }

// kernel: conv_bn_silu.2
= control target key start
LH: loop header
LB: loop body
LE: loop exit
PB: predicated region body
PF: predicated region fallthrough
CT: control target
= control target key end

     0   :  { %s4930_s12 = smov 0   ;;  %s4932_s13 = smov 0   ;;  %s6179_s0 = inlined_call_operand.vmem [shape: bf16[2,1,18,18,128], index: 0, kind: input, shape index: {}]   ;;  %s6180_s1 = inlined_call_operand.vmem [shape: bf16[9,128,128], index: 1, kind: input, shape index: {}]   ;;  %s6181_s2 = inlined_call_operand.vmem [shape: f32[2,16,16,128], index: 2, kind: output, shape index: {0}]   ;;  %s6182_s3 = inlined_call_operand.vmem [shape: f32[2,1,2,128], index: 3, kind: output, shape index: {1}]  }
   0x1   :  { %s4934_s14 = smov 0  }
   0x2 LB: > { %s26_s15 = sadd.s32 1, %s4904_s13  ;;  %p3682_p0 = scmp.ge.s32.totalorder %s4908_s14, 1  ;;  %s4908_s14 = sphi %s4934_s14, %s14_s14   ;;  %s4904_s13 = sphi %s4932_s13, %s6227_s13   ;;  %s4900_s12 = sphi %s4930_s12, %s6226_s12  }
   0x3   : > { %p28_p1 = scmp.ge.s32.totalorder %s26_s15, 2  ;;  %p162_p2 = scmp.lt.s32.totalorder %s4908_s14, 3 }
   0x5   : > { %s6229_s15 = smov (%p28_p1, %s26_s15), 0  ;;  %p163_p3 = pnand %p3682_p0, %p162_p2 }
   0x7   : > { %166 = sbr.rel (%p163_p3) target bundleno = 655 (0x28f), region = 28 }
   0xe   : > { %v4779_v0 = vld [vmem:[%s6180_s1 + $0x40] sm:$0xff]   ;;  %p202_p4 = scmp.lt.s32.totalorder %s4900_s12, 1  ;;  %v4781_v2 = vld [vmem:[%s6180_s1 + $0x48] sm:$0xff]   ;;  %v4783_v4 = vld [vmem:[%s6180_s1 + $0x50] sm:$0xff]   ;;  %vm428_vm0 = vsmask.f32 3328 }
   0xf   : > { %v4780_v1 = vld [vmem:[%s6180_s1 + $0x100] sm:$0xff]   ;;  %4050 = vmatprep.subr.bf16.mxu1 %v4779_v0  ;;  %v4782_v3 = vld [vmem:[%s6180_s1 + $0x108] sm:$0xff]   ;;  %v4784_v5 = vld [vmem:[%s6180_s1 + $0x110] sm:$0xff]   ;;  %vm429_vm1 = vsmask.f32 7440  ;;  %vm1409_vm3 = vcmask 1042432  }
  0x10   : > { %4242 = vmatprep.subr.bf16.mxu0 %v4780_v1  ;;  %4051 = vmatpush3.bf16.msra.mxu1 %v4779_v0  ;;  %s6231_s12 = smov (!%p202_p4, %s4900_s12), 1  ;;  %v4785_v6 = vld [vmem:[%s6180_s1 + $0x58] sm:$0xff]   ;;  %v4787_v8 = vld [vmem:[%s6180_s1 + $0x60] sm:$0xff]   ;;  %v4789_v10 = vld [vmem:[%s6180_s1 + $0x68] sm:$0xff]   ;;  %vm1410_vm4 = vcmask 1046532   ;;  %vm3538_vm6 = vcmask 1040384  }
  0x11   : > { %4243 = vmatpush3.bf16.msra.mxu0 %v4780_v1  ;;  %4052 = vmatprep.subr.bf16.mxu1 %v4781_v2  ;;  %v4786_v7 = vld [vmem:[%s6180_s1 + $0x118] sm:$0xff]   ;;  %s4754_s5 = smul.u32 216, %s6231_s12  ;;  %v4788_v9 = vld [vmem:[%s6180_s1 + $0x120] sm:$0xff]   ;;  %v4790_v11 = vld [vmem:[%s6180_s1 + $0x128] sm:$0xff]   ;;  %s3833_s24 = sshll.u32 %s6231_s12, 8 }
  0x12   : > { %4244 = vmatprep.subr.bf16.mxu0 %v4782_v3  ;;  %v4791_v17 = vld [vmem:[%s6180_s1 + $0x70] sm:$0xff]   ;;  %v4793_v36 = vld [vmem:[%s6180_s1 + $0x78] sm:$0xff]   ;;  %vm5029_vm2 = vmor %vm428_vm0, %vm429_vm1  ;;  %s5934_s27 = scalar_lea.vmem %s6181_s2, %s3833_s24  ;;  %s3686_s28 = sshll.u32 %s6231_s12, 1 }
  0x13   : > { %s4984_s16 = scalar_lea.vmem %s6179_s0, %s4754_s5  ;;  %v4792_v31 = vld [vmem:[%s6180_s1 + $0x130] sm:$0xff]   ;;  %v4794_v53 = vld [vmem:[%s6180_s1 + $0x138] sm:$0xff]   ;;  %v4795_v1 = vld [vmem:[%s6180_s1] sm:$0xff]   ;;  %s228_s4 = scalar_lea.vmem %s6182_s3, %s3686_s28 }
  0x14   : > { %4053 = vmatpush3.bf16.msra.mxu1 %v4781_v2  ;;  %v4993_v12 = vld [vmem:[%s4984_s16] sm:$0xf]  ;;  %v4996_v13 = vld [vmem:[%s4984_s16 + $0x4] sm:$0xf]  ;;  %v232_v14 = vld [vmem:[%s4984_s16 + $0x8] sm:$0x1] }
  0x15   : > { %4245 = vmatpush3.bf16.msra.mxu0 %v4782_v3  ;;  %4054 = vmatprep.subr.bf16.mxu1 %v4783_v4  ;;  %v432_v15 = vshrl.u32 %v4993_v12, 16  ;;  %v435_v16 = vshll.u32 %v4993_v12, 16  ;;  %v441_v18 = vshll.u32 %v4996_v13, 16  ;;  %v445_v19 = vshrl.u32 %v4996_v13, 16  ;;  %v5007_v21 = vld [vmem:[%s4984_s16 + $0xc] sm:$0xf]  ;;  %vm5236_vm5 = vmor %vm1409_vm3, %vm1410_vm4 }
  0x16   : > { %4246 = vmatprep.subr.bf16.mxu0 %v4784_v5  ;;  %v451_v20 = vshll.u32 %v232_v14, 16  ;;  %v5010_v24 = vld [vmem:[%s4984_s16 + $0x10] sm:$0xf]  ;;  %v5013_v25 = vld [vmem:[%s4984_s16 + $0x14] sm:$0x1]  ;;  %v456_v30 = vshrl.u32 %v5007_v21, 16 }
  0x17   : > { %v434_v22 = vrot.slane %v432_v15, 4  ;;  %v437_v23 = vrot.slane %v435_v16, 5  ;;  %v443_v27 = vrot.slane %v441_v18, 5  ;;  %v447_v28 = vrot.slane %v445_v19, 4  ;;  %v5035_v41 = vld [vmem:[%s4984_s16 + $0x18] sm:$0xf] }
  0x18   : > { %4055 = vmatpush3.bf16.msra.mxu1 %v4783_v4  ;;  %v453_v29 = vrot.slane %v451_v20, 5  ;;  %v459_v33 = vshll.u32 %v5007_v21, 16  ;;  %v465_v34 = vshll.u32 %v5010_v24, 16  ;;  %v469_v35 = vshrl.u32 %v5010_v24, 16  ;;  %v5038_v42 = vld [vmem:[%s4984_s16 + $0x1c] sm:$0xf] }
  0x19   : > { %4247 = vmatpush3.bf16.msra.mxu0 %v4784_v5  ;;  %4056 = vmatprep.subr.bf16.mxu1 %v4785_v6  ;;  %v438_v32 = vor.u32 %v437_v23, %v434_v22  ;;  %v448_v38 = vor.u32 %v447_v28, %v443_v27  ;;  %v458_v39 = vrot.slane %v456_v30, 4  ;;  %v475_v40 = vshll.u32 %v5013_v25, 16  ;;  %v5045_v48 = vld [vmem:[%s4984_s16 + $0x20] sm:$0x1]  ;;  %v5062_v3 = vld [vmem:[%s4984_s16 + $0x24] sm:$0xf] }
  0x1a   : > { %4248 = vmatprep.subr.bf16.mxu0 %v4786_v7  ;;  %v5042_v43 = vcombine.low %v5007_v21, %v5010_v24  ;;  %v461_v45 = vrot.slane %v459_v33, 5  ;;  %v467_v46 = vrot.slane %v465_v34, 5  ;;  %v471_v47 = vrot.slane %v469_v35, 4  ;;  %v5077_v14 = vld [vmem:[%s4984_s16 + $0x2c] sm:$0x1]  ;;  %v4885_v37 = vld [vmem:[%s6180_s1 + $0x138] sm:$0xff]  }
  0x1b   : > { %v439_v44 = vrot.slane %v438_v32, 4  ;;  %v449_v49 = vrot.slane %v448_v38, 4  ;;  %v477_v50 = vrot.slane %v475_v40, 5  ;;  %v480_v51 = vshrl.u32 %v5035_v41, 16  ;;  %v5082_v22 = vld [vmem:[%s4984_s16 + $0x30] sm:$0xf] }
  0x1c   : > { %4057 = vmatpush3.bf16.msra.mxu1 %v4785_v6  ;;  %v483_v52 = vshll.u32 %v5035_v41, 16  ;;  %v462_v55 = vor.u32 %v461_v45, %v458_v39  ;;  %v472_v56 = vor.u32 %v471_v47, %v467_v46  ;;  %v489_v57 = vshll.u32 %v5038_v42, 16  ;;  %v5087_v30 = vld [vmem:[%s4984_s16 + $0x34] sm:$0xf]  ;;  %v4798_v34 = vld [vmem:[%s6180_s1 + $0x8] sm:$0xff]  }
  0x1d   : > { %4249 = vmatpush3.bf16.msra.mxu0 %v4786_v7  ;;  %4058 = vmatprep.subr.bf16.mxu1 %v4787_v8  ;;  %v444_v54 = vsel %vm5029_vm2, %v439_v44, %v443_v27  ;;  %v454_v58 = vsel %vm5029_vm2, %v449_v49, %v453_v29  ;;  %v482_v59 = vrot.slane %v480_v51, 4  ;;  %v493_v61 = vshrl.u32 %v5038_v42, 16  ;;  %v5096_v35 = vld [vmem:[%s4984_s16 + $0x38] sm:$0x1] }
  0x1e   : > { %4250 = vmatprep.subr.bf16.mxu0 %v4788_v9  ;;  %v485_v60 = vrot.slane %v483_v52, 5  ;;  %v3687_v62 = vcombine.low %v444_v54, %v454_v58  ;;  %v463_v63 = vrot.slane %v462_v55, 4  ;;  %v473_v0 = vrot.slane %v472_v56, 4  ;;  %v5111_v58 = vld [vmem:[%s4984_s16 + $0x3c] sm:$0xf] }
  0x1f   : > { %v491_v2 = vrot.slane %v489_v57, 5  ;;  %v495_v5 = vrot.slane %v493_v61, 4  ;;  %v499_v6 = vshll.u32 %v5045_v48, 16  ;;  %v1431_v7 = vrot.slane %v5045_v48, 5 }
  0x20   : > { %4059 = vmatpush3.bf16.msra.mxu1 %v4787_v8  ;;  %v486_v4 = vor.u32 %v485_v60, %v482_v59  ;;  %v4796_v8 = vld [vmem:[%s6180_s1 + $0x140] sm:$0xff]   ;;  %4066 = vmatprep.mubr.bf16.mxu1 %v3687_v62  ;;  %v504_v15 = vshrl.u32 %v5062_v3, 16  ;;  %v507_v16 = vshll.u32 %v5062_v3, 16  ;;  %v523_v33 = vshll.u32 %v5077_v14, 16  ;;  %v4801_v59 = vld [vmem:[%s6180_s1 + $0x10] sm:$0xff]  }
  0x21   : > { %4251 = vmatpush3.bf16.msra.mxu0 %v4788_v9  ;;  %4060 = vmatprep.subr.bf16.mxu1 %v4789_v10  ;;  %v5070_v9 = vld [vmem:[%s4984_s16 + $0x28] sm:$0xf]  ;;  %v496_v19 = vor.u32 %v495_v5, %v491_v2  ;;  %v501_v20 = vrot.slane %v499_v6, 5  ;;  %v531_v44 = vshll.u32 %v5082_v22, 16  ;;  %v541_v56 = vshrl.u32 %v5087_v30, 16 }
  0x22   : > { %4252 = vmatprep.subr.bf16.mxu0 %v4790_v11  ;;  %v487_v18 = vrot.slane %v486_v4, 4  ;;  %v506_v23 = vrot.slane %v504_v15, 4  ;;  %v509_v27 = vrot.slane %v507_v16, 5  ;;  %v513_v28 = vshll.u32 %v5070_v9, 16  ;;  %v4799_v16 = vld [vmem:[%s6180_s1 + $0x150] sm:$0xff]  }
  0x23   : > { %v517_v29 = vshrl.u32 %v5070_v9, 16  ;;  %v497_v32 = vrot.slane %v496_v19, 4  ;;  %v525_v47 = vrot.slane %v523_v33, 5  ;;  %v533_v54 = vrot.slane %v531_v44, 5  ;;  %v5151_v33 = vld [vmem:[%s4984_s16 + $0x50] sm:$0x1] }
  0x24   : > { %4061 = vmatpush3.bf16.msra.mxu1 %v4789_v10  ;;  %v468_v10 = vsel %vm5029_vm2, %v463_v63, %v467_v46  ;;  %v510_v38 = vor.u32 %v509_v27, %v506_v23  ;;  %v515_v39 = vrot.slane %v513_v28, 5  ;;  %v4797_v46 = vld [vmem:[%s6180_s1 + $0x148] sm:$0xff]   ;;  %v547_v57 = vshll.u32 %v5096_v35, 16 }
  0x25   : > { %4253 = vmatpush3.bf16.msra.mxu0 %v4790_v11  ;;  %4062 = vmatprep.subr.bf16.mxu1 %v4791_v17  ;;  %v478_v11 = vsel %vm5029_vm2, %v473_v0, %v477_v50  ;;  %v519_v40 = vrot.slane %v517_v29, 4  ;;  %v502_v45 = vsel %vm5029_vm2, %v497_v32, %v501_v20  ;;  %v537_v50 = vshll.u32 %v5087_v30, 16  ;;  %v5125_v0 = vld [vmem:[%s4984_s16 + $0x40] sm:$0xf]  ;;  %v5142_v27 = vld [vmem:[%s4984_s16 + $0x48] sm:$0xf] }
  0x26   : > { %4254 = vmatprep.subr.bf16.mxu0 %v4792_v31  ;;  %v511_v52 = vrot.slane %v510_v38, 4  ;;  %v5118_v60 = vcombine.low %v5035_v41, %v5038_v42  ;;  %v543_v4 = vrot.slane %v541_v56, 4  ;;  %v549_v5 = vrot.slane %v547_v57, 5  ;;  %v5145_v28 = vld [vmem:[%s4984_s16 + $0x4c] sm:$0xf] }
  0x27   : > { %v539_v55 = vrot.slane %v537_v50, 5  ;;  %v555_v6 = vshll.u32 %v5111_v58, 16  ;;  %v585_v44 = vshll.u32 %v5145_v28, 16  ;;  %v589_v50 = vshrl.u32 %v5145_v28, 16 }
  0x28   : > { %4063 = vmatpush3.bf16.msra.mxu1 %v4791_v17  ;;  %v3688_v17 = vcombine.low %v468_v10, %v478_v11  ;;  %v516_v61 = vsel %vm5029_vm2, %v511_v52, %v515_v39  ;;  %v561_v10 = vshll.u32 %v5125_v0, 16 }
  0x29   : > { %4255 = vmatpush3.bf16.msra.mxu0 %v4792_v31  ;;  %4064 = vmatprep.subr.bf16.mxu1 %v4793_v36  ;;  %v492_v31 = vsel %vm5029_vm2, %v487_v18, %v491_v2  ;;  %v552_v2 = vshrl.u32 %v5111_v58, 16  ;;  %v544_v19 = vor.u32 %v543_v4, %v539_v55  ;;  %v557_v20 = vrot.slane %v555_v6, 5  ;;  %v5182_v6 = vld [vmem:[%s4984_s16 + $0x58] sm:$0xf] }
  0x2a   : > { %4256 = vmatprep.subr.bf16.mxu0 %v4794_v53  ;;  %4258 = vmatprep.mubr.bf16.mxu0 %v3688_v17  ;;  %v5106_v51 = vcombine.low %v492_v31, %v502_v45  ;;  %v563_v23 = vrot.slane %v561_v10, 5  ;;  %v4800_v45 = vld [vmem:[%s6180_s1 + $0x158] sm:$0xff]  }
  0x2b   : > { %v545_v38 = vrot.slane %v544_v19, 4  ;;  %v5185_v10 = vld [vmem:[%s4984_s16 + $0x5c] sm:$0x1] }
  0x2c   : > { %4065 = vmatpush3.bf16.msra.mxu1 %v4793_v36  ;;  %v528_v36 = vshrl.u32 %v5082_v22, 16 }
  0x2d   : > { %4257 = vmatpush3.bf16.msra.mxu0 %v4794_v53  ;;  %4098 = vmatprep.subr.bf16.mxu1 %v4795_v1  ;;  %v520_v53 = vor.u32 %v519_v40, %v515_v39  ;;  %v579_v40 = vshll.u32 %v5142_v27, 16  ;;  %v550_v52 = vsel %vm5029_vm2, %v545_v38, %v549_v5  ;;  %v5179_v5 = vld [vmem:[%s4984_s16 + $0x54] sm:$0xf] }
  0x2e   : > { %4290 = vmatprep.subr.bf16.mxu0 %v4796_v8  ;;  %v530_v49 = vrot.slane %v528_v36, 4  ;;  %v4804_v36 = vld [vmem:[%s6180_s1 + $0x18] sm:$0xff]   ;;  %v600_v19 = vshrl.u32 %v5179_v5, 16 }
  0x2f   : > { %4067 = vmatmul.mubr.bf16.vlgmr.msra.gmra.mrb[0].mxu1 %v3688_v17  ;;  %v521_v62 = vrot.slane %v520_v53, 4  ;;  %v565_v17 = vshrl.u32 %v5125_v0, 16 }
  0x30   : > { %4099 = vmatpush3.bf16.msra.mxu1 %v4795_v1  ;;  %4259 = vmatmul.mubr.bf16.vlgmr.msra.gmra.mrb[0].mxu0 %v5106_v51  ;;  %v534_v63 = vor.u32 %v533_v54, %v530_v49  ;;  %v5128_v1 = vld [vmem:[%s4984_s16 + $0x44] sm:$0x1]  ;;  %v581_v54 = vrot.slane %v579_v40, 5  ;;  %v613_v40 = vshrl.u32 %v5182_v6, 16 }
  0x31   : > { %4100 = vmatprep.subr.bf16.mxu1 %v4798_v34  ;;  %4070 = vmatprep.mubr.bf16.mxu1 %v5106_v51  ;;  %v526_v11 = vsel %vm5029_vm2, %v521_v62, %v525_v47  ;;  %v567_v31 = vrot.slane %v565_v17, 4  ;;  %v571_v32 = vshll.u32 %v5128_v1, 16  ;;  %v595_v62 = vshll.u32 %v5151_v33, 16 }
  0x32   : > { %4291 = vmatpush3.bf16.msra.mxu0 %v4796_v8  ;;  %v535_v15 = vrot.slane %v534_v63, 4  ;;  %v554_v8 = vrot.slane %v552_v2, 4  ;;  %v5139_v18 = vcombine.low %v516_v61, %v526_v11  ;;  %v591_v61 = vrot.slane %v589_v50, 4  ;;  %v4802_v63 = vld [vmem:[%s6180_s1 + $0x160] sm:$0xff]   ;;  %v5219_v50 = vld [vmem:[%s4984_s16 + $0x68] sm:$0x1] }
  0x33   : > { %4292 = vmatprep.subr.bf16.mxu0 %v4797_v46  ;;  %v568_v47 = vor.u32 %v567_v31, %v563_v23  ;;  %v573_v49 = vrot.slane %v571_v32, 5  ;;  %v4807_v2 = vld [vmem:[%s6180_s1 + $0x20] sm:$0xff]   ;;  %v5189_v11 = vcombine.low %v5062_v3, %v5070_v9  ;;  %v597_v17 = vrot.slane %v595_v62, 5 }
  0x34   : > { %4101 = vmatpush3.bf16.msra.mxu1 %v4798_v34  ;;  %6201 = vst [vmem:[#allocation2_spill] sm:$0xff] %v5139_v18  ;;  %v540_v29 = vsel %vm5029_vm2, %v535_v15, %v539_v55  ;;  %v576_v34 = vshrl.u32 %v5142_v27, 16  ;;  %4262 = vmatprep.mubr.bf16.mxu0 %v5139_v18  ;;  %v558_v39 = vor.u32 %v557_v20, %v554_v8  ;;  %v587_v55 = vrot.slane %v585_v44, 5  ;;  %v5205_v32 = vld [vmem:[%s4984_s16 + $0x60] sm:$0xf] }
  0x35   : > { %4102 = vmatprep.subr.bf16.mxu1 %v4801_v59  ;;  %v5167_v56 = vcombine.low %v540_v29, %v550_v52  ;;  %v569_v57 = vrot.slane %v568_v47, 4  ;;  %v5193_v15 = vcombine.low %v5082_v22, %v5087_v30  ;;  %v603_v29 = vshll.u32 %v5179_v5, 16  ;;  %v5213_v47 = vld [vmem:[%s4984_s16 + $0x64] sm:$0xf] }
  0x36   : > { %4293 = vmatpush3.bf16.msra.mxu0 %v4797_v46  ;;  %v578_v46 = vrot.slane %v576_v34, 4  ;;  %v559_v53 = vrot.slane %v558_v39, 4  ;;  %v592_v8 = vor.u32 %v591_v61, %v587_v55  ;;  %v609_v31 = vshll.u32 %v5182_v6, 16  ;;  %v4809_v34 = vld [vmem:[%s6180_s1 + $0x28] sm:$0xff]  }
  0x37   : > { %4071 = vmatmul.mubr.bf16.gmra.mrb[4].mxu1 %v5139_v18  ;;  %4294 = vmatprep.subr.bf16.mxu0 %v4799_v16  ;;  %6202 = vst [vmem:[#allocation3_spill] sm:$0xff] %v5167_v56  ;;  %v602_v39 = vrot.slane %v600_v19, 4  ;;  %v619_v44 = vshll.u32 %v5185_v10, 16  ;;  %v624_v52 = vshrl.u32 %v5205_v32, 16  ;;  %v643_v19 = vshll.u32 %v5219_v50, 16 }
  0x38   : > { %4103 = vmatpush3.bf16.msra.mxu1 %v4801_v59  ;;  %v564_v4 = vsel %vm5029_vm2, %v559_v53, %v563_v23  ;;  %v582_v59 = vor.u32 %v581_v54, %v578_v46  ;;  %4263 = vmatmul.mubr.bf16.gmra.mrb[4].mxu0 %v5167_v56  ;;  %v593_v38 = vrot.slane %v592_v8, 4  ;;  %v611_v46 = vrot.slane %v609_v31, 5 }
  0x39   : > { %4104 = vmatprep.subr.bf16.mxu1 %v4804_v36  ;;  %4074 = vmatprep.mubr.bf16.mxu1 %v5167_v56  ;;  %v615_v54 = vrot.slane %v613_v40, 4  ;;  %v5247_v40 = vld [vmem:[%s4984_s16 + $0x6c] sm:$0xf] }
  0x3a   : > { %4295 = vmatpush3.bf16.msra.mxu0 %v4799_v16  ;;  %v574_v16 = vsel %vm5029_vm2, %v569_v57, %v573_v49  ;;  %v583_v23 = vrot.slane %v582_v59, 4  ;;  %v598_v53 = vsel %vm5029_vm2, %v593_v38, %v597_v17  ;;  %v621_v57 = vrot.slane %v619_v44, 5 }
  0x3b   : > { %4296 = vmatprep.subr.bf16.mxu0 %v4800_v45  ;;  %v5200_v20 = vcombine.low %v564_v4, %v574_v16  ;;  %v626_v4 = vrot.slane %v624_v52, 4  ;;  %v633_v59 = vshll.u32 %v5213_v47, 16  ;;  %v616_v16 = vor.u32 %v615_v54, %v611_v46 }
  0x3c   : > { %4105 = vmatpush3.bf16.msra.mxu1 %v4804_v36  ;;  %v588_v49 = vsel %vm5029_vm2, %v583_v23, %v587_v55  ;;  %v605_v36 = vrot.slane %v603_v29, 5  ;;  %v627_v55 = vshll.u32 %v5205_v32, 16  ;;  %v637_v17 = vshrl.u32 %v5213_v47, 16  ;;  %v4811_v29 = vld [vmem:[%s6180_s1 + $0x30] sm:$0xff]  }
  0x3d   : > { %6203 = vst [vmem:[#allocation4_spill] sm:$0xff] %v5200_v20  ;;  %4106 = vmatprep.subr.bf16.mxu1 %v4807_v2  ;;  %4266 = vmatprep.mubr.bf16.mxu0 %v5200_v20  ;;  %v5229_v61 = vcombine.low %v588_v49, %v598_v53  ;;  %v635_v31 = vrot.slane %v633_v59, 5  ;;  %v3736_v38 = vrot.slane %v5007_v21, 9  ;;  %v617_v44 = vrot.slane %v616_v16, 4  ;;  %v5254_v53 = vld [vmem:[%s4984_s16 + $0x70] sm:$0xf] }
  0x3e   : > { %4297 = vmatpush3.bf16.msra.mxu0 %v4800_v45  ;;  %v4803_v45 = vld [vmem:[%s6180_s1 + $0x168] sm:$0xff]   ;;  %v606_v62 = vor.u32 %v605_v36, %v602_v39  ;;  %v629_v8 = vrot.slane %v627_v55, 5  ;;  %v1421_v39 = vrot.slane %v5010_v24, 5  ;;  %v639_v36 = vrot.slane %v637_v17, 4 }
  0x3f   : > { %4075 = vmatmul.mubr.bf16.gmra.mrb[8].mxu1 %v5200_v20  ;;  %4298 = vmatprep.subr.bf16.mxu0 %v4802_v63  ;;  %6204 = vst [vmem:[#allocation5_spill] sm:$0xff] %v5229_v61  ;;  %v645_v52 = vrot.slane %v643_v19, 5  ;;  %v1424_v55 = vrot.slane %v5013_v25, 5  ;;  %v622_v59 = vsel %vm5029_vm2, %v617_v44, %v621_v57  ;;  %v657_v19 = vshll.u32 %v5254_v53, 16 }
  0x40   : > { %4107 = vmatpush3.bf16.msra.mxu1 %v4807_v2  ;;  %4078 = vmatprep.mubr.bf16.mxu1 %v5229_v61  ;;  %v607_v2 = vrot.slane %v606_v62, 4  ;;  %v630_v49 = vor.u32 %v629_v8, %v626_v4  ;;  %v1422_v24 = vsel %vm5236_vm5, %v3736_v38, %v1421_v39  ;;  %v1423_v54 = vrot.slane %v1421_v39, 4  ;;  %v5262_v62 = vld [vmem:[%s4984_s16 + $0x74] sm:$0x1]  ;;  %v4813_v4 = vld [vmem:[%s6180_s1 + $0x38] sm:$0xff]  }
  0x41   : > { %4108 = vmatprep.subr.bf16.mxu1 %v4809_v34  ;;  %4267 = vmatmul.mubr.bf16.gmra.mrb[8].mxu0 %v5229_v61  ;;  %v640_v8 = vor.u32 %v639_v36, %v635_v31  ;;  %v659_v36 = vrot.slane %v657_v19, 5  ;;  %v1442_v20 = vrot.slane %v5087_v30, 5 }
  0x42   : > { %4299 = vmatpush3.bf16.msra.mxu0 %v4802_v63  ;;  %v4805_v63 = vld [vmem:[%s6180_s1 + $0x170] sm:$0xff]   ;;  %v612_v21 = vsel %vm5029_vm2, %v607_v2, %v611_v46  ;;  %v631_v16 = vrot.slane %v630_v49, 4  ;;  %v648_v46 = vshrl.u32 %v5247_v40, 16  ;;  %v1425_v25 = vsel %vm5236_vm5, %v1423_v54, %v1424_v55  ;;  %v5277_v2 = vld [vmem:[%s4984_s16 + $0x78] sm:$0xf] }
  0x43   : > { %4300 = vmatprep.subr.bf16.mxu0 %v4803_v45  ;;  %v5270_v17 = vcombine.low %v612_v21, %v622_v59  ;;  %v641_v38 = vrot.slane %v640_v8, 4  ;;  %v5284_v39 = vcombine.low %v1422_v24, %v1425_v25  ;;  %v661_v21 = vshrl.u32 %v5254_v53, 16  ;;  %v5291_v54 = vld [vmem:[%s4984_s16 + $0x7c] sm:$0xf] }
  0x44   : > { %4109 = vmatpush3.bf16.msra.mxu1 %v4809_v34  ;;  %v651_v34 = vshll.u32 %v5247_v40, 16  ;;  %v636_v57 = vsel %vm5029_vm2, %v631_v16, %v635_v31  ;;  %v650_v44 = vrot.slane %v648_v46, 4  ;;  %v667_v31 = vshll.u32 %v5262_v62, 16  ;;  %v5298_v16 = vld [vmem:[%s4984_s16 + $0x80] sm:$0x1] }
  0x45   : > { %4110 = vmatprep.subr.bf16.mxu1 %v4811_v29  ;;  %6207 = vst [vmem:[#allocation6_spill] sm:$0xff] %v5270_v17  ;;  %4270 = vmatprep.mubr.bf16.mxu0 %v5270_v17  ;;  %v646_v55 = vsel %vm5029_vm2, %v641_v38, %v645_v52  ;;  %v3737_v59 = vrot.slane %v5035_v41, 9  ;;  %v1428_v24 = vrot.slane %v5038_v42, 5  ;;  %v672_v8 = vshrl.u32 %v5277_v2, 16  ;;  %v5306_v52 = vld [vmem:[%s6180_s1 + $0x80] sm:$0xff]  }
  0x46   : > { %4301 = vmatpush3.bf16.msra.mxu0 %v4803_v45  ;;  %v4806_v45 = vld [vmem:[%s6180_s1 + $0x178] sm:$0xff]   ;;  %v653_v49 = vrot.slane %v651_v34, 5  ;;  %v5301_v46 = vcombine.low %v636_v57, %v646_v55  ;;  %v663_v34 = vrot.slane %v661_v21, 4  ;;  %v669_v19 = vrot.slane %v667_v31, 5  ;;  %v5315_v38 = vld [vmem:[%s4984_s16 + $0x84] sm:$0xf] }
  0x47   : > { %4302 = vmatprep.subr.bf16.mxu0 %v4805_v63  ;;  %4079 = vmatmul.mubr.bf16.gmra.mrb[12].mxu1 %v5270_v17  ;;  %v1429_v41 = vsel %vm5236_vm5, %v3737_v59, %v1428_v24  ;;  %v1430_v42 = vrot.slane %v1428_v24, 4  ;;  %v674_v57 = vrot.slane %v672_v8, 4  ;;  %v681_v21 = vshll.u32 %v5291_v54, 16 }
  0x48   : > { %4111 = vmatpush3.bf16.msra.mxu1 %v4811_v29  ;;  %6208 = vst [vmem:[#allocation7_spill] sm:$0xff] %v5301_v46  ;;  %v654_v25 = vor.u32 %v653_v49, %v650_v44  ;;  %v4808_v29 = vld [vmem:[%s6180_s1 + $0x180] sm:$0xff]   ;;  %4082 = vmatprep.mubr.bf16.mxu1 %v5301_v46  ;;  %v664_v49 = vor.u32 %v663_v34, %v659_v36  ;;  %v685_v31 = vshrl.u32 %v5291_v54, 16  ;;  %v691_v24 = vshll.u32 %v5298_v16, 16 }
  0x49   : > { %4112 = vmatprep.subr.bf16.mxu1 %v4813_v4  ;;  %4271 = vmatmul.mubr.bf16.gmra.mrb[12].mxu0 %v5301_v46  ;;  %v1432_v55 = vsel %vm5236_vm5, %v1430_v42, %v1431_v7  ;;  %v3738_v8 = vrot.slane %v5062_v3, 9  ;;  %v683_v46 = vrot.slane %v681_v21, 5  ;;  %v5335_v3 = vld [vmem:[%s4984_s16 + $0x88] sm:$0xf] }
  0x4a   : > { %4303 = vmatpush3.bf16.msra.mxu0 %v4805_v63  ;;  %v675_v63 = vshll.u32 %v5277_v2, 16  ;;  %v655_v44 = vrot.slane %v654_v25, 4  ;;  %4306 = vmatprep.mubr.bf16.mxu0 %v5284_v39  ;;  %v665_v34 = vrot.slane %v664_v49, 4  ;;  %v5330_v26 = vcombine.low %v1429_v41, %v1432_v55 }
  0x4b   : > { %4304 = vmatprep.subr.bf16.mxu0 %v4806_v45  ;;  %v687_v7 = vrot.slane %v685_v31, 4  ;;  %v693_v42 = vrot.slane %v691_v24, 5  ;;  %v696_v41 = vshrl.u32 %v5315_v38, 16  ;;  %v4810_v31 = vld [vmem:[%s6180_s1 + $0x188] sm:$0xff]   ;;  %v5354_v24 = vld [vmem:[%s4984_s16 + $0x90] sm:$0xf] }
  0x4c   : > { %v677_v59 = vrot.slane %v675_v63, 5  ;;  %4113 = vmatpush3.bf16.msra.mxu1 %v4813_v4  ;;  %v660_v25 = vsel %vm5029_vm2, %v655_v44, %v659_v36  ;;  %v1435_v63 = vrot.slane %v5070_v9, 5  ;;  %v670_v4 = vsel %vm5029_vm2, %v665_v34, %v669_v19  ;;  %v5341_v36 = vld [vmem:[%s4984_s16 + $0x8c] sm:$0x1]  ;;  %v5357_v34 = vld [vmem:[%s4984_s16 + $0x94] sm:$0xf] }
  0x4d   : > { %4146 = vmatprep.subr.bf16.mxu1 %v5306_v52  ;;  %v699_v44 = vshll.u32 %v5315_v38, 16  ;;  %v688_v21 = vor.u32 %v687_v7, %v683_v46  ;;  %v698_v55 = vrot.slane %v696_v41, 4  ;;  %v715_v7 = vshll.u32 %v5341_v36, 16 }
  0x4e   : > { %4305 = vmatpush3.bf16.msra.mxu0 %v4806_v45  ;;  %v678_v48 = vor.u32 %v677_v59, %v674_v57  ;;  %v1438_v45 = vrot.slane %v5077_v14, 5  ;;  %v5345_v57 = vcombine.low %v660_v25, %v670_v4  ;;  %v1436_v9 = vsel %vm5236_vm5, %v3738_v8, %v1435_v63 }
  0x4f   : > { %4338 = vmatprep.subr.bf16.mxu0 %v4808_v29  ;;  %v1437_v19 = vrot.slane %v1435_v63, 4  ;;  %v701_v14 = vrot.slane %v699_v44, 5  ;;  %v705_v59 = vshll.u32 %v5335_v3, 16  ;;  %v709_v8 = vshrl.u32 %v5335_v3, 16 }
  0x50   : > { %6209 = vst [vmem:[#allocation8_spill] sm:$0xff] %v5345_v57  ;;  %v679_v49 = vrot.slane %v678_v48, 4  ;;  %4083 = vmatmul.mubr.bf16.gmra.mrb[16].mxu1 %v5345_v57  ;;  %v689_v48 = vrot.slane %v688_v21, 4  ;;  %v3739_v44 = vrot.slane %v5082_v22, 9  ;;  %v717_v21 = vrot.slane %v715_v7, 5  ;;  %v4812_v22 = vld [vmem:[%s6180_s1 + $0x190] sm:$0xff]  }
  0x51   : > { %4307 = vmatmul.mubr.bf16.vlgmr.msra.gmra.mrb[0].mxu0 %v5330_v26  ;;  %v1439_v63 = vsel %vm5236_vm5, %v1437_v19, %v1438_v45  ;;  %v702_v4 = vor.u32 %v701_v14, %v698_v55  ;;  %v707_v41 = vrot.slane %v705_v59, 5  ;;  %v1445_v45 = vrot.slane %v5096_v35, 5  ;;  %v5393_v59 = vld [vmem:[%s4984_s16 + $0x9c] sm:$0xf] }
  0x52   : > { %v684_v25 = vsel %vm5029_vm2, %v679_v49, %v683_v46  ;;  %4339 = vmatpush3.bf16.msra.mxu0 %v4808_v29  ;;  %v694_v57 = vsel %vm5029_vm2, %v689_v48, %v693_v42  ;;  %v5370_v46 = vcombine.low %v1436_v9, %v1439_v63  ;;  %v711_v49 = vrot.slane %v709_v8, 4  ;;  %v5381_v42 = vld [vmem:[%s4984_s16 + $0x98] sm:$0x1]  ;;  %v5396_v63 = vld [vmem:[%s4984_s16 + $0xa0] sm:$0xf] }
  0x53   : > { %v5372_v17 = vcombine.low %v684_v25, %v694_v57  ;;  %v703_v61 = vrot.slane %v702_v4, 4  ;;  %4340 = vmatprep.subr.bf16.mxu0 %v4810_v31  ;;  %v720_v57 = vshrl.u32 %v5354_v24, 16  ;;  %v723_v9 = vshll.u32 %v5354_v24, 16 }
  0x54   : > { %4310 = vmatprep.mubr.bf16.mxu0 %v5370_v46  ;;  %v712_v29 = vor.u32 %v711_v49, %v707_v41  ;;  %v729_v19 = vshll.u32 %v5357_v34, 16  ;;  %v1443_v35 = vsel %vm5236_vm5, %v3739_v44, %v1442_v20  ;;  %v1444_v55 = vrot.slane %v1442_v20, 4  ;;  %v5403_v20 = vld [vmem:[%s4984_s16 + $0xa4] sm:$0x1] }
  0x55   : > { %6210 = vst [vmem:[#allocation9_spill] sm:$0xff] %v5372_v17  ;;  %4086 = vmatprep.mubr.bf16.mxu1 %v5372_v17  ;;  %v708_v30 = vsel %vm5029_vm2, %v703_v61, %v707_v41  ;;  %v733_v14 = vshrl.u32 %v5357_v34, 16  ;;  %v722_v48 = vrot.slane %v720_v57, 4  ;;  %v725_v8 = vrot.slane %v723_v9, 5 }
  0x56   : > { %v713_v25 = vrot.slane %v712_v29, 4  ;;  %4341 = vmatpush3.bf16.msra.mxu0 %v4810_v31  ;;  %v731_v7 = vrot.slane %v729_v19, 5  ;;  %v1446_v4 = vsel %vm5236_vm5, %v1444_v55, %v1445_v45  ;;  %v739_v61 = vshll.u32 %v5381_v42, 16  ;;  %v4814_v45 = vld [vmem:[%s6180_s1 + $0x198] sm:$0xff]  }
  0x57   : > { %v735_v49 = vrot.slane %v733_v14, 4  ;;  %v3740_v41 = vrot.slane %v5111_v58, 9  ;;  %4342 = vmatprep.subr.bf16.mxu0 %v4812_v22  ;;  %v5407_v44 = vcombine.low %v1443_v35, %v1446_v4  ;;  %v726_v29 = vor.u32 %v725_v8, %v722_v48 }
  0x58   : > { %v718_v31 = vsel %vm5029_vm2, %v713_v25, %v717_v21  ;;  %v1449_v57 = vrot.slane %v5125_v0, 5  ;;  %v741_v58 = vrot.slane %v739_v61, 5  ;;  %v1452_v55 = vrot.slane %v5128_v1, 5  ;;  %v5421_v25 = vld [vmem:[%s4984_s16 + $0xa8] sm:$0xf] }
  0x59   : > { %v5413_v9 = vcombine.low %v708_v30, %v718_v31  ;;  %v736_v19 = vor.u32 %v735_v49, %v731_v7  ;;  %4311 = vmatmul.mubr.bf16.gmra.mrb[4].mxu0 %v5407_v44  ;;  %v727_v14 = vrot.slane %v726_v29, 4  ;;  %v744_v0 = vshrl.u32 %v5393_v59, 16  ;;  %v4818_v30 = vld [vmem:[%s6180_s1 + $0x1a0] sm:$0xff]   ;;  %v5431_v49 = vld [vmem:[%s4984_s16 + $0xac] sm:$0xf] }
  0x5a   : > { %v1450_v21 = vsel %vm5236_vm5, %v3740_v41, %v1449_v57  ;;  %v1451_v35 = vrot.slane %v1449_v57, 4  ;;  %v747_v1 = vshll.u32 %v5393_v59, 16  ;;  %v753_v8 = vshll.u32 %v5396_v63, 16  ;;  %4343 = vmatpush3.bf16.msra.mxu0 %v4812_v22 }
  0x5b   : > { %6211 = vst [vmem:[#allocation10_spill] sm:$0xff] %v5413_v9  ;;  %4087 = vmatmul.mubr.bf16.gmra.mrb[20].mxu1 %v5413_v9  ;;  %v737_v48 = vrot.slane %v736_v19, 4  ;;  %v757_v4 = vshrl.u32 %v5396_v63, 16  ;;  %v732_v61 = vsel %vm5029_vm2, %v727_v14, %v731_v7  ;;  %v746_v31 = vrot.slane %v744_v0, 4  ;;  %4344 = vmatprep.subr.bf16.mxu0 %v4814_v45  ;;  %v5446_v14 = vld [vmem:[%s4984_s16 + $0xb0] sm:$0x1] }
  0x5c   : > { %v1453_v41 = vsel %vm5236_vm5, %v1451_v35, %v1452_v55  ;;  %v763_v29 = vshll.u32 %v5403_v20, 16  ;;  %v749_v9 = vrot.slane %v747_v1, 5  ;;  %v755_v17 = vrot.slane %v753_v8, 5 }
  0x5d   : > { %v742_v57 = vsel %vm5029_vm2, %v737_v48, %v741_v58  ;;  %v5440_v19 = vcombine.low %v1450_v21, %v1453_v41  ;;  %v759_v56 = vrot.slane %v757_v4, 4  ;;  %v3741_v7 = vrot.slane %v5142_v27, 9 }
  0x5e   : > { %v5442_v22 = vcombine.low %v732_v61, %v742_v57  ;;  %v765_v18 = vrot.slane %v763_v29, 5  ;;  %v750_v55 = vor.u32 %v749_v9, %v746_v31  ;;  %v1456_v35 = vrot.slane %v5145_v28, 5  ;;  %4345 = vmatpush3.bf16.msra.mxu0 %v4814_v45  ;;  %v4822_v28 = vld [vmem:[%s6180_s1 + $0x1a8] sm:$0xff]  }
  0x5f   : > { %4314 = vmatprep.mubr.bf16.mxu0 %v5440_v19  ;;  %v1459_v0 = vrot.slane %v5151_v33, 5  ;;  %v768_v58 = vshrl.u32 %v5421_v25, 16  ;;  %v760_v21 = vor.u32 %v759_v56, %v755_v17  ;;  %v771_v48 = vshll.u32 %v5421_v25, 16  ;;  %4346 = vmatprep.subr.bf16.mxu0 %v4818_v30 }
  0x60   : > { %6212 = vst [vmem:[#allocation11_spill] sm:$0xff] %v5442_v22  ;;  %4090 = vmatprep.mubr.bf16.mxu1 %v5442_v22  ;;  %v777_v1 = vshll.u32 %v5431_v49, 16  ;;  %v781_v27 = vshrl.u32 %v5431_v49, 16  ;;  %v751_v9 = vrot.slane %v750_v55, 4  ;;  %v1457_v33 = vsel %vm5236_vm5, %v3741_v7, %v1456_v35  ;;  %v5468_v22 = vld [vmem:[%s4984_s16 + $0xb4] sm:$0xf] }
  0x61   : > { %v1458_v45 = vrot.slane %v1456_v35, 4  ;;  %v770_v8 = vrot.slane %v768_v58, 4  ;;  %v761_v56 = vrot.slane %v760_v21, 4  ;;  %v773_v4 = vrot.slane %v771_v48, 5  ;;  %v5475_v48 = vld [vmem:[%s4984_s16 + $0xb8] sm:$0xf] }
  0x62   : > { %v779_v61 = vrot.slane %v777_v1, 5  ;;  %v783_v41 = vrot.slane %v781_v27, 4  ;;  %v756_v31 = vsel %vm5029_vm2, %v751_v9, %v755_v17  ;;  %v787_v57 = vshll.u32 %v5446_v14, 16  ;;  %4347 = vmatpush3.bf16.msra.mxu0 %v4818_v30  ;;  %v4826_v17 = vld [vmem:[%s6180_s1 + $0x1b0] sm:$0xff]   ;;  %v5485_v27 = vld [vmem:[%s4984_s16 + $0xbc] sm:$0x1] }
  0x63   : > { %v1460_v29 = vsel %vm5236_vm5, %v1458_v45, %v1459_v0  ;;  %v3742_v55 = vrot.slane %v5179_v5, 9  ;;  %v766_v7 = vsel %vm5029_vm2, %v761_v56, %v765_v18  ;;  %v774_v58 = vor.u32 %v773_v4, %v770_v8  ;;  %4348 = vmatprep.subr.bf16.mxu0 %v4822_v28  ;;  %v4830_v4 = vld [vmem:[%s6180_s1 + $0x1b8] sm:$0xff]  }
  0x64   : > { %v5472_v35 = vcombine.low %v1457_v33, %v1460_v29  ;;  %v784_v21 = vor.u32 %v783_v41, %v779_v61  ;;  %v5480_v0 = vcombine.low %v756_v31, %v766_v7  ;;  %v789_v5 = vrot.slane %v787_v57, 5 }
  0x65   : > { %v1463_v1 = vrot.slane %v5182_v6, 5  ;;  %v1466_v30 = vrot.slane %v5185_v10, 5  ;;  %v775_v18 = vrot.slane %v774_v58, 4  ;;  %v792_v33 = vshrl.u32 %v5468_v22, 16 }
  0x66   : > { %6213 = vst [vmem:[#allocation12_spill] sm:$0xff] %v5480_v0  ;;  %4315 = vmatmul.mubr.bf16.gmra.mrb[8].mxu0 %v5472_v35  ;;  %v785_v9 = vrot.slane %v784_v21, 4  ;;  %v795_v45 = vshll.u32 %v5468_v22, 16  ;;  %4091 = vmatmul.mubr.bf16.gmra.mrb[24].mxu1 %v5480_v0  ;;  %v801_v6 = vshll.u32 %v5475_v48, 16  ;;  %v805_v10 = vshrl.u32 %v5475_v48, 16 }
  0x67   : > { %v1464_v8 = vsel %vm5236_vm5, %v3742_v55, %v1463_v1  ;;  %v1465_v56 = vrot.slane %v1463_v1, 4  ;;  %4349 = vmatpush3.bf16.msra.mxu0 %v4822_v28  ;;  %v780_v41 = vsel %vm5029_vm2, %v775_v18, %v779_v61  ;;  %v794_v29 = vrot.slane %v792_v33, 4 }
  0x68   : > { %v790_v31 = vsel %vm5029_vm2, %v785_v9, %v789_v5  ;;  %v797_v57 = vrot.slane %v795_v45, 5  ;;  %4350 = vmatprep.subr.bf16.mxu0 %v4826_v17  ;;  %v803_v58 = vrot.slane %v801_v6, 5  ;;  %v807_v28 = vrot.slane %v805_v10, 4 }
  0x69   : > { %v5502_v55 = vcombine.low %v780_v41, %v790_v31  ;;  %v1467_v7 = vsel %vm5236_vm5, %v1465_v56, %v1466_v30  ;;  %v811_v0 = vshll.u32 %v5485_v27, 16  ;;  %v3743_v61 = vrot.slane %v5205_v32, 9  ;;  %v5517_v30 = vld [vmem:[%s6180_s1 + $0x1c0] sm:$0xff]  }
  0x6a   : > { %v5506_v21 = vcombine.low %v1464_v8, %v1467_v7  ;;  %v798_v1 = vor.u32 %v797_v57, %v794_v29  ;;  %v808_v5 = vor.u32 %v807_v28, %v803_v58  ;;  %v1470_v18 = vrot.slane %v5213_v47, 5 }
  0x6b   : > { %4094 = vmatprep.mubr.bf16.mxu1 %v5502_v55  ;;  %v1473_v9 = vrot.slane %v5219_v50, 5  ;;  %v3744_v33 = vrot.slane %v5247_v40, 9  ;;  %4351 = vmatpush3.bf16.msra.mxu0 %v4826_v17  ;;  %v813_v8 = vrot.slane %v811_v0, 5  ;;  %v1477_v56 = vrot.slane %v5254_v53, 5 }
  0x6c   : > { %4318 = vmatprep.mubr.bf16.mxu0 %v5506_v21  ;;  %v799_v45 = vrot.slane %v798_v1, 4  ;;  %v1480_v6 = vrot.slane %v5262_v62, 5  ;;  %4352 = vmatprep.subr.bf16.mxu0 %v4830_v4  ;;  %v809_v10 = vrot.slane %v808_v5, 4  ;;  %v1471_v50 = vsel %vm5236_vm5, %v3743_v61, %v1470_v18 }
  0x6d   : > { %v1472_v41 = vrot.slane %v1470_v18, 4  ;;  %v3745_v17 = vrot.slane %v5277_v2, 9  ;;  %v1478_v29 = vsel %vm5236_vm5, %v3744_v33, %v1477_v56  ;;  %v1479_v57 = vrot.slane %v1477_v56, 4 }
  0x6e   : > { %v804_v31 = vsel %vm5029_vm2, %v799_v45, %v803_v58  ;;  %v1484_v0 = vrot.slane %v5291_v54, 5  ;;  %v814_v62 = vsel %vm5029_vm2, %v809_v10, %v813_v8  ;;  %v1487_v28 = vrot.slane %v5298_v16, 5 }
  0x6f   : > { %v1474_v7 = vsel %vm5236_vm5, %v1472_v41, %v1473_v9  ;;  %v3746_v1 = vrot.slane %v5315_v38, 9  ;;  %4353 = vmatpush3.bf16.msra.mxu0 %v4830_v4  ;;  %v5536_v61 = vcombine.low %v804_v31, %v814_v62  ;;  %v1481_v5 = vsel %vm5236_vm5, %v1479_v57, %v1480_v6  ;;  %v4821_v57 = vld [vmem:[%s6180_s1 + $0x88] sm:$0xff]  }
  0x70   : > { %v5538_v58 = vcombine.low %v1471_v50, %v1474_v7  ;;  %4386 = vmatprep.subr.bf16.mxu0 %v5517_v30  ;;  %v5543_v18 = vcombine.low %v1478_v29, %v1481_v5  ;;  %v1486_v33 = vrot.slane %v1484_v0, 4  ;;  %v1491_v45 = vrot.slane %v5335_v3, 5 }
  0x71   : > { %v1494_v9 = vrot.slane %v5341_v36, 5  ;;  %4095 = vmatmul.mubr.bf16.gmra.mrb[28].mxu1 %v5536_v61  ;;  %v6214_v16 = vcombine.low %v4993_v12, %v4996_v13  ;;  %v1485_v4 = vsel %vm5236_vm5, %v3745_v17, %v1484_v0  ;;  %v1498_v6 = vrot.slane %v5357_v34, 5 }
  0x72   : > { %4319 = vmatmul.mubr.bf16.gmra.mrb[12].mxu0 %v5538_v58  ;;  %v1488_v8 = vsel %vm5236_vm5, %v1486_v33, %v1487_v28  ;;  %v1493_v56 = vrot.slane %v1491_v45, 4  ;;  %v1505_v36 = vrot.slane %v5396_v63, 5  ;;  %v1492_v10 = vsel %vm5236_vm5, %v3746_v1, %v1491_v45 }
  0x73   : > { %4114 = vmatprep.mubr.bf16.mxu1 %v6214_v16  ;;  %4322 = vmatprep.mubr.bf16.mxu0 %v5543_v18  ;;  %v5563_v13 = vcombine.low %v1485_v4, %v1488_v8  ;;  %v3747_v50 = vrot.slane %v5354_v24, 9  ;;  %v1501_v41 = vrot.slane %v5381_v42, 5  ;;  %v1500_v17 = vrot.slane %v1498_v6, 4 }
  0x74   : > { %v1495_v12 = vsel %vm5236_vm5, %v1493_v56, %v1494_v9  ;;  %v3748_v31 = vrot.slane %v5393_v59, 9  ;;  %v1507_v0 = vrot.slane %v1505_v36, 4  ;;  %v1508_v62 = vrot.slane %v5403_v20, 5 }
  0x75   : > { %v5568_v29 = vcombine.low %v1492_v10, %v1495_v12  ;;  %v1499_v7 = vsel %vm5236_vm5, %v3747_v50, %v1498_v6  ;;  %v1512_v42 = vrot.slane %v5431_v49, 5  ;;  %v5581_v28 = vcombine.low %v5205_v32, %v5213_v47  ;;  %v4825_v47 = vld [vmem:[%s6180_s1 + $0x90] sm:$0xff]   ;;  %v280_v6 = vld [vmem:[%s4984_s16 + $0xc8] sm:$0x1]  ;;  %v4870_v10 = vld [vmem:[%s4984_s16 + $0x40] sm:$0xf] }
  0x76   : > { %v1502_v20 = vsel %vm5236_vm5, %v1500_v17, %v1501_v41  ;;  %v1506_v1 = vsel %vm5236_vm5, %v3748_v31, %v1505_v36  ;;  %v3749_v5 = vrot.slane %v5421_v25, 9  ;;  %v5592_v33 = vcombine.low %v5247_v40, %v5254_v53  ;;  %v4869_v36 = vld [vmem:[%s4984_s16 + $0x3c] sm:$0xf]  ;;  %v4871_v41 = vld [vmem:[%s4984_s16 + $0x48] sm:$0xf] }
  0x77   : > { %v1509_v32 = vsel %vm5236_vm5, %v1507_v0, %v1508_v62  ;;  %v5603_v45 = vcombine.low %v5277_v2, %v5291_v54  ;;  %v5607_v40 = vcombine.low %v5315_v38, %v5335_v3  ;;  %v5611_v53 = vcombine.low %v5354_v24, %v5357_v34  ;;  %v5631_v24 = vld [vmem:[%s4984_s16 + $0xc4] sm:$0xf]  ;;  %v4872_v17 = vld [vmem:[%s4984_s16 + $0x4c] sm:$0xf] }
  0x78   : > { %v5615_v9 = vcombine.low %v5393_v59, %v5396_v63  ;;  %v5619_v16 = vcombine.low %v5421_v25, %v5431_v49  ;;  %v5621_v4 = vcombine.low %v1499_v7, %v1502_v20  ;;  %v1514_v2 = vrot.slane %v1512_v42, 4  ;;  %v4829_v25 = vld [vmem:[%s6180_s1 + $0x98] sm:$0xff]  }
  0x79   : > { %4115 = vmatmul.mubr.bf16.vlgmr.msra.gmra.mrb[0].mxu1 %v5042_v43  ;;  %v1515_v54 = vrot.slane %v5446_v14, 5  ;;  %v5626_v38 = vcombine.low %v5468_v22, %v5475_v48  ;;  %v5628_v3 = vcombine.low %v1506_v1, %v1509_v32  ;;  %v3750_v34 = vrot.slane %v5468_v22, 9  ;;  %v5645_v14 = vld [vmem:[%s4984_s16 + $0xc0] sm:$0xf] }
  0x7a   : > { %4323 = vmatmul.mubr.bf16.gmra.mrb[16].mxu0 %v5563_v13  ;;  %4147 = vmatpush3.bf16.msra.mxu1 %v5306_v52  ;;  %v1519_v52 = vrot.slane %v5475_v48, 5  ;;  %v1522_v63 = vrot.slane %v5485_v27, 5  ;;  %v1513_v49 = vsel %vm5236_vm5, %v3749_v5, %v1512_v42  ;;  %v2348_v48 = vrot.slane %v5631_v24, 5  ;;  %v4833_v27 = vld [vmem:[%s6180_s1 + $0xa0] sm:$0xff]  }
  0x7b   : > { %4118 = vmatprep.mubr.bf16.mxu1 %v5118_v60  ;;  %4326 = vmatprep.mubr.bf16.mxu0 %v5568_v29  ;;  %v1516_v22 = vsel %vm5236_vm5, %v1514_v2, %v1515_v54  ;;  %v5660_v12 = vcombine.low %v4869_v36, %v4870_v10  ;;  %v5666_v31 = vcombine.low %v4871_v41, %v4872_v17  ;;  %v2080_v0 = vshll.u32 %v5645_v14, 16  ;;  %v4837_v54 = vld [vmem:[%s6180_s1 + $0xa8] sm:$0xff]   ;;  %v4841_v36 = vld [vmem:[%s6180_s1 + $0xb0] sm:$0xff]   ;;  %v4874_v10 = vld [vmem:[%s4984_s16 + $0x58] sm:$0xf] }
  0x7c   : > { %4148 = vmatprep.subr.bf16.mxu1 %v4821_v57  ;;  %v1521_v59 = vrot.slane %v1519_v52, 4  ;;  %v1520_v8 = vsel %vm5236_vm5, %v3750_v34, %v1519_v52  ;;  %v5662_v50 = vcombine.low %v1513_v49, %v1516_v22  ;;  %v2086_v62 = vshll.u32 %v5631_v24, 16 }
  0x7d   : > { %v2090_v7 = vshrl.u32 %v5631_v24, 16  ;;  %v3793_v20 = vrot.slane %v5645_v14, 9  ;;  %v2350_v1 = vrot.slane %v2348_v48, 4  ;;  %v2351_v5 = vrot.slane %v280_v6, 5 }
  0x7e   : > { %4149 = vmatpush3.bf16.msra.mxu1 %v4821_v57  ;;  %v1523_v56 = vsel %vm5236_vm5, %v1521_v59, %v1522_v63  ;;  %v2077_v57 = vshrl.u32 %v5645_v14, 16  ;;  %v2088_v52 = vrot.slane %v2086_v62, 5  ;;  %v2096_v63 = vshll.u32 %v280_v6, 16  ;;  %v4873_v6 = vld [vmem:[%s4984_s16 + $0x54] sm:$0xf]  ;;  %v4847_v62 = vld [vmem:[%s6180_s1 + $0xc0] sm:$0xff]  }
  0x7f   : > { %4150 = vmatprep.subr.bf16.mxu1 %v4825_v47  ;;  %v5672_v42 = vcombine.low %v1520_v8, %v1523_v56  ;;  %v2092_v2 = vrot.slane %v2090_v7, 4  ;;  %v2352_v49 = vsel %vm5236_vm5, %v2350_v1, %v2351_v5  ;;  %v5691_v41 = vcombine.low %v4873_v6, %v4874_v10  ;;  %v4838_v7 = vld [vmem:[%s6180_s1 + $0x1c8] sm:$0xff]   ;;  %v4846_v1 = vld [vmem:[%s6180_s1 + $0x1d8] sm:$0xff]   ;;  %v4851_v6 = vld [vmem:[%s6180_s1 + $0xd0] sm:$0xff]  }
  0x80   : > { %v2079_v32 = vrot.slane %v2077_v57, 4  ;;  %v2098_v56 = vrot.slane %v2096_v63, 5  ;;  %v4854_v10 = vld [vmem:[%s6180_s1 + $0xd8] sm:$0xff]  }
  0x81   : > { %4119 = vmatmul.mubr.bf16.gmra.mrb[4].mxu1 %v5189_v11  ;;  %v2093_v59 = vor.u32 %v2092_v2, %v2088_v52  ;;  %v4877_v2 = vld [vmem:[%s4984_s16] sm:$0xf] }
  0x82   : > { %4327 = vmatmul.mubr.bf16.gmra.mrb[20].mxu0 %v5621_v4  ;;  %4122 = vmatprep.mubr.bf16.mxu1 %v5193_v15 }
  0x83   : > { %4330 = vmatprep.mubr.bf16.mxu0 %v5628_v3  ;;  %4151 = vmatpush3.bf16.msra.mxu1 %v4825_v47  ;;  %v2082_v47 = vrot.slane %v2080_v0, 5  ;;  %v2094_v8 = vrot.slane %v2093_v59, 4  ;;  %v4845_v0 = vld [vmem:[%s6180_s1 + $0xb8] sm:$0xff]   ;;  %v4850_v59 = vld [vmem:[%s6180_s1 + $0x1e8] sm:$0xff]  }
  0x84   : > { %4152 = vmatprep.subr.bf16.mxu1 %v4829_v25 }
  0x85   : > { %v2083_v34 = vor.u32 %v2082_v47, %v2079_v32  ;;  %v4848_v32 = vld [vmem:[%s6180_s1 + $0x1e0] sm:$0xff]   ;;  %v4876_v47 = vld [vmem:[%s4984_s16 + $0x8] sm:$0x1] }
  0x87   : > { %4153 = vmatpush3.bf16.msra.mxu1 %v4829_v25  ;;  %v2349_v25 = vsel %vm5236_vm5, %v3793_v20, %v2348_v48  ;;  %v2084_v22 = vrot.slane %v2083_v34, 4  ;;  %v4842_v20 = vld [vmem:[%s6180_s1 + $0x1d0] sm:$0xff]  }
  0x88   : > { %4154 = vmatprep.subr.bf16.mxu1 %v4833_v27  ;;  %v5693_v17 = vcombine.low %v2349_v25, %v2352_v49  ;;  %v4852_v49 = vld [vmem:[%s6180_s1 + $0x1f0] sm:$0xff]  }
  0x89   : > { %4123 = vmatmul.mubr.bf16.gmra.mrb[8].mxu1 %v5660_v12  ;;  %v2089_v48 = vsel %vm5029_vm2, %v2084_v22, %v2088_v52  ;;  %v1417_v52 = vrot.slane %v4876_v47, 5  ;;  %v6217_v47 = vld [vmem:[#allocation4_spill] sm:$0xff] }
  0x8a   : > { %4331 = vmatmul.mubr.bf16.gmra.mrb[24].mxu0 %v5662_v50  ;;  %4126 = vmatprep.mubr.bf16.mxu1 %v5666_v31 }
  0x8b   : > { %4334 = vmatprep.mubr.bf16.mxu0 %v5672_v42  ;;  %4155 = vmatpush3.bf16.msra.mxu1 %v4833_v27  ;;  %v2099_v27 = vsel %vm5029_vm2, %v2094_v8, %v2098_v56  ;;  %v4856_v8 = vld [vmem:[%s6180_s1 + $0x1f8] sm:$0xff]   ;;  %v4858_v56 = vld [vmem:[%s6180_s1 + $0x200] sm:$0xff]  }
  0x8c   : > { %4156 = vmatprep.subr.bf16.mxu1 %v4837_v54  ;;  %v5699_v57 = vcombine.low %v2089_v48, %v2099_v27  ;;  %v5780_v48 = vcombine.low %v5645_v14, %v5631_v24  ;;  %v4859_v27 = vld [vmem:[%s6180_s1 + $0xe8] sm:$0xff]   ;;  %v4861_v24 = vld [vmem:[%s6180_s1 + $0xf0] sm:$0xff]  }
  0x8f   : > { %4157 = vmatpush3.bf16.msra.mxu1 %v4837_v54  ;;  %v3735_v54 = vrot.slane %v4877_v2, 9  ;;  %v4865_v2 = vld [vmem:[%s6180_s1 + $0x220] sm:$0xff]  }
  0x90   : > { %4158 = vmatprep.subr.bf16.mxu1 %v4841_v36 }
  0x91   : > { %4127 = vmatmul.mubr.bf16.gmra.mrb[12].mxu1 %v5691_v41 }
  0x92   : > { %4335 = vmatmul.mubr.bf16.gmra.mrb[28].mxu0 %v5693_v17  ;;  %4130 = vmatprep.mubr.bf16.mxu1 %v5581_v28 }
  0x93   : > { %4354 = vmatprep.mubr.bf16.mxu0 %v5118_v60  ;;  %4159 = vmatpush3.bf16.msra.mxu1 %v4841_v36  ;;  %v4849_v36 = vld [vmem:[%s6180_s1 + $0xc8] sm:$0xff]  }
  0x94   : > { %4160 = vmatprep.subr.bf16.mxu1 %v4845_v0 }
  0x97   : > { %4161 = vmatpush3.bf16.msra.mxu1 %v4845_v0  ;;  %v5790_v0 = vld [vmem:[%s4984_s16 + $0xcc] sm:$0xf] }
  0x98   : > { %4194 = vmatprep.subr.bf16.mxu1 %v4847_v62 }
  0x99   : > { %4131 = vmatmul.mubr.bf16.gmra.mrb[16].mxu1 %v5592_v33 }
  0x9a   : > { %4355 = vmatmul.mubr.bf16.vlgmr.msra.gmra.mrb[0].mxu0 %v5189_v11  ;;  %4134 = vmatprep.mubr.bf16.mxu1 %v5603_v45 }
  0x9b   : > { %4387 = vmatpush3.bf16.msra.mxu0 %v5517_v30  ;;  %4358 = vmatprep.mubr.bf16.mxu0 %v5193_v15  ;;  %v4875_v30 = vld [vmem:[%s4984_s16 + $0x4] sm:$0xf] }
  0x9c   : > { %4388 = vmatprep.subr.bf16.mxu0 %v4838_v7  ;;  %v1414_v5 = vrot.slane %v4875_v30, 5  ;;  %v6215_v30 = vld [vmem:[#allocation2_spill] sm:$0xff] }
  0x9e   : > { %v1416_v34 = vrot.slane %v1414_v5, 4  ;;  %v1415_v63 = vsel %vm5236_vm5, %v3735_v54, %v1414_v5  ;;  %v4862_v5 = vld [vmem:[%s6180_s1 + $0x210] sm:$0xff]   ;;  %v4866_v54 = vld [vmem:[%s6180_s1 + $0x228] sm:$0xff]  }
  0x9f   : > { %4389 = vmatpush3.bf16.msra.mxu0 %v4838_v7  ;;  %v4863_v7 = vld [vmem:[%s6180_s1 + $0xf8] sm:$0xff]  }
  0xa0   : > { %4390 = vmatprep.subr.bf16.mxu0 %v4842_v20  ;;  %v1418_v25 = vsel %vm5236_vm5, %v1416_v34, %v1417_v52  ;;  %v6218_v52 = vld [vmem:[#allocation5_spill] sm:$0xff]  ;;  %v6219_v34 = vld [vmem:[#allocation6_spill] sm:$0xff] }
  0xa1   : > { %4135 = vmatmul.mubr.bf16.gmra.mrb[20].mxu1 %v5607_v40  ;;  %v3751_v22 = vcombine.low %v1415_v63, %v1418_v25  ;;  %v4867_v63 = vld [vmem:[%s6180_s1 + $0x230] sm:$0xff]   ;;  %v4868_v25 = vld [vmem:[%s6180_s1 + $0x238] sm:$0xff]  }
  0xa2   : > { %4359 = vmatmul.mubr.bf16.gmra.mrb[4].mxu0 %v5660_v12  ;;  %4138 = vmatprep.mubr.bf16.mxu1 %v5611_v53 }
  0xa3   : > { %4362 = vmatprep.mubr.bf16.mxu0 %v5666_v31  ;;  %4391 = vmatpush3.bf16.msra.mxu0 %v4842_v20  ;;  %v4860_v20 = vld [vmem:[%s6180_s1 + $0x208] sm:$0xff]  }
  0xa4   : > { %4392 = vmatprep.subr.bf16.mxu0 %v4846_v1 }
  0xa7   : > { %4393 = vmatpush3.bf16.msra.mxu0 %v4846_v1  ;;  %v4878_v1 = vld [vmem:[%s6180_s1 + $0x100] sm:$0xff]  }
  0xa8   : > { %4394 = vmatprep.subr.bf16.mxu0 %v4848_v32 }
  0xa9   : > { %4139 = vmatmul.mubr.bf16.gmra.mrb[24].mxu1 %v5615_v9 }
  0xaa   : > { %4363 = vmatmul.mubr.bf16.gmra.mrb[8].mxu0 %v5691_v41  ;;  %4142 = vmatprep.mubr.bf16.mxu1 %v5619_v16 }
  0xab   : > { %4366 = vmatprep.mubr.bf16.mxu0 %v5581_v28  ;;  %4395 = vmatpush3.bf16.msra.mxu0 %v4848_v32  ;;  %v4864_v32 = vld [vmem:[%s6180_s1 + $0x218] sm:$0xff]  }
  0xac   : > { %4396 = vmatprep.subr.bf16.mxu0 %v4850_v59 }
  0xaf   : > { %4397 = vmatpush3.bf16.msra.mxu0 %v4850_v59  ;;  %v6220_v59 = vld [vmem:[#allocation7_spill] sm:$0xff] }
  0xb0   : > { %4398 = vmatprep.subr.bf16.mxu0 %v4852_v49 }
  0xb1   : > { %4143 = vmatmul.mubr.bf16.gmra.mrb[28].mxu1 %v5626_v38 }
  0xb2   : > { %4367 = vmatmul.mubr.bf16.gmra.mrb[12].mxu0 %v5592_v33  ;;  %4162 = vmatprep.mubr.bf16.mxu1 %v3751_v22  ;;  %v6222_v22 = vld [vmem:[#allocation9_spill] sm:$0xff] }
  0xb3   : > { %4370 = vmatprep.mubr.bf16.mxu0 %v5603_v45  ;;  %4399 = vmatpush3.bf16.msra.mxu0 %v4852_v49  ;;  %v6221_v49 = vld [vmem:[#allocation8_spill] sm:$0xff] }
  0xb4   : > { %4400 = vmatprep.subr.bf16.mxu0 %v4856_v8 }
  0xb7   : > { %4401 = vmatpush3.bf16.msra.mxu0 %v4856_v8  ;;  %v6223_v8 = vld [vmem:[#allocation10_spill] sm:$0xff] }
  0xb8   : > { %4434 = vmatprep.subr.bf16.mxu0 %v4858_v56 }
  0xb9   : > { %4163 = vmatmul.mubr.bf16.vlgmr.msra.gmra.mrb[0].mxu1 %v5284_v39  ;;  %v4857_v39 = vld [vmem:[%s6180_s1 + $0xe0] sm:$0xff]  }
  0xba   : > { %4371 = vmatmul.mubr.bf16.gmra.mrb[16].mxu0 %v5607_v40  ;;  %4195 = vmatpush3.bf16.msra.mxu1 %v4847_v62  ;;  %v5793_v62 = vld [vmem:[%s4984_s16 + $0xd0] sm:$0xf] }
  0xbb   : > { %4166 = vmatprep.mubr.bf16.mxu1 %v5330_v26  ;;  %4374 = vmatprep.mubr.bf16.mxu0 %v5611_v53  ;;  %v3803_v14 = vcombine.low %v5790_v0, %v5793_v62 }
  0xbc   : > { %4196 = vmatprep.subr.bf16.mxu1 %v4849_v36 }
  0xbe   : > { %4197 = vmatpush3.bf16.msra.mxu1 %v4849_v36  ;;  %v2849_v36 = vshll.u32 %v5790_v0, 16 }
  0xbf   : > { %4198 = vmatprep.subr.bf16.mxu1 %v4851_v6 }
  0xc1   : > { %4167 = vmatmul.mubr.bf16.gmra.mrb[4].mxu1 %v5370_v46 }
  0xc2   : > { %4375 = vmatmul.mubr.bf16.gmra.mrb[20].mxu0 %v5615_v9  ;;  %4170 = vmatprep.mubr.bf16.mxu1 %v5407_v44 }
  0xc3   : > { %4378 = vmatprep.mubr.bf16.mxu0 %v5619_v16  ;;  %4199 = vmatpush3.bf16.msra.mxu1 %v4851_v6  ;;  %v2859_v6 = vshrl.u32 %v5793_v62, 16 }
  0xc4   : > { %4200 = vmatprep.subr.bf16.mxu1 %v4854_v10 }
  0xc7   : > { %4201 = vmatpush3.bf16.msra.mxu1 %v4854_v10  ;;  %v6224_v10 = vld [vmem:[#allocation11_spill] sm:$0xff] }
  0xc8   : > { %4202 = vmatprep.subr.bf16.mxu1 %v4857_v39 }
  0xc9   : > { %4171 = vmatmul.mubr.bf16.gmra.mrb[8].mxu1 %v5440_v19 }
  0xca   : > { %4379 = vmatmul.mubr.bf16.gmra.mrb[24].mxu0 %v5626_v38  ;;  %4174 = vmatprep.mubr.bf16.mxu1 %v5472_v35 }
  0xcb   : > { %4382 = vmatprep.mubr.bf16.mxu0 %v5780_v48  ;;  %4203 = vmatpush3.bf16.msra.mxu1 %v4857_v39 }
  0xcc   : > { %4204 = vmatprep.subr.bf16.mxu1 %v4859_v27 }
  0xcf   : > { %4205 = vmatpush3.bf16.msra.mxu1 %v4859_v27  ;;  %v2851_v27 = vrot.slane %v2849_v36, 5 }
  0xd0   : > { %4206 = vmatprep.subr.bf16.mxu1 %v4861_v24 }
  0xd1   : > { %4175 = vmatmul.mubr.bf16.gmra.mrb[12].mxu1 %v5506_v21 }
  0xd2   : > { %4383 = vmatmul.mubr.bf16.gmra.mrb[28].mxu0 %v3803_v14  ;;  %4178 = vmatprep.mubr.bf16.mxu1 %v5538_v58  ;;  %v2861_v14 = vrot.slane %v2859_v6, 4 }
  0xd3   : > { %4402 = vmatprep.mubr.bf16.mxu0 %v5106_v51  ;;  %4207 = vmatpush3.bf16.msra.mxu1 %v4861_v24  ;;  %v6216_v51 = vld [vmem:[#allocation3_spill] sm:$0xff] }
  0xd4   : > { %4208 = vmatprep.subr.bf16.mxu1 %v4863_v7 }
  0xd7   : > { %4209 = vmatpush3.bf16.msra.mxu1 %v4863_v7  ;;  %v4880_v7 = vld [vmem:[%s6180_s1 + $0x110] sm:$0xff]  }
  0xd8   : > { %4482 = vmatprep.subr.bf16.mxu1 %v4878_v1 }
  0xd9   : > { %4179 = vmatmul.mubr.bf16.gmra.mrb[16].mxu1 %v5543_v18 }
  0xda   : > { %4403 = vmatmul.mubr.bf16.vlgmr.msra.gmra.mrb[0].mxu0 %v6215_v30  ;;  %4182 = vmatprep.mubr.bf16.mxu1 %v5563_v13 }
  0xdb   : > { %4435 = vmatpush3.bf16.msra.mxu0 %v4858_v56  ;;  %4406 = vmatprep.mubr.bf16.mxu0 %v6216_v51  ;;  %v2846_v56 = vshrl.u32 %v5790_v0, 16 }
  0xdc   : > { %4436 = vmatprep.subr.bf16.mxu0 %v4860_v20 }
  0xdd   : > { %v2848_v39 = vrot.slane %v2846_v56, 4 }
  0xdf   : > { %4437 = vmatpush3.bf16.msra.mxu0 %v4860_v20  ;;  %v6225_v20 = vld [vmem:[#allocation12_spill] sm:$0xff] }
  0xe0   : > { %4438 = vmatprep.subr.bf16.mxu0 %v4862_v5 }
  0xe1   : > { %4183 = vmatmul.mubr.bf16.gmra.mrb[20].mxu1 %v5568_v29 }
  0xe2   : > { %4407 = vmatmul.mubr.bf16.gmra.mrb[4].mxu0 %v6217_v47  ;;  %4186 = vmatprep.mubr.bf16.mxu1 %v5621_v4 }
  0xe3   : > { %4410 = vmatprep.mubr.bf16.mxu0 %v6218_v52  ;;  %4439 = vmatpush3.bf16.msra.mxu0 %v4862_v5  ;;  %v4881_v5 = vld [vmem:[%s6180_s1 + $0x118] sm:$0xff]  }
  0xe4   : > { %4440 = vmatprep.subr.bf16.mxu0 %v4864_v32 }
  0xe7   : > { %4441 = vmatpush3.bf16.msra.mxu0 %v4864_v32 }
  0xe8   : > { %4442 = vmatprep.subr.bf16.mxu0 %v4865_v2 }
  0xe9   : > { %4187 = vmatmul.mubr.bf16.gmra.mrb[24].mxu1 %v5628_v3 }
  0xea   : > { %4411 = vmatmul.mubr.bf16.gmra.mrb[8].mxu0 %v6219_v34  ;;  %4190 = vmatprep.mubr.bf16.mxu1 %v5662_v50 }
  0xeb   : > { %4414 = vmatprep.mubr.bf16.mxu0 %v6220_v59  ;;  %4443 = vmatpush3.bf16.msra.mxu0 %v4865_v2 }
  0xec   : > { %4444 = vmatprep.subr.bf16.mxu0 %v4866_v54 }
  0xef   : > { %4445 = vmatpush3.bf16.msra.mxu0 %v4866_v54  ;;  %v4883_v54 = vld [vmem:[%s6180_s1 + $0x128] sm:$0xff]  }
  0xf0   : > { %4446 = vmatprep.subr.bf16.mxu0 %v4867_v63 }
  0xf1   : > { %4191 = vmatmul.mubr.bf16.gmra.mrb[28].mxu1 %v5672_v42 }
  0xf2   : > { %4415 = vmatmul.mubr.bf16.gmra.mrb[12].mxu0 %v6221_v49  ;;  %4210 = vmatprep.mubr.bf16.mxu1 %v5042_v43  ;;  %v2855_v43 = vshll.u32 %v5793_v62, 16 }
  0xf3   : > { %4418 = vmatprep.mubr.bf16.mxu0 %v6222_v22  ;;  %4447 = vmatpush3.bf16.msra.mxu0 %v4867_v63 }
  0xf4   : > { %4448 = vmatprep.subr.bf16.mxu0 %v4868_v25  ;;  %v2857_v24 = vrot.slane %v2855_v43, 5 }
  0xf6   : > { %v2862_v30 = vor.u32 %v2861_v14, %v2857_v24 }
  0xf7   : > { %4449 = vmatpush3.bf16.msra.mxu0 %v4868_v25 }
  0xf8   : > { %v2863_v47 = vrot.slane %v2862_v30, 4 }
  0xf9   : > { %4211 = vmatmul.mubr.bf16.vlgmr.msra.gmra.mrb[0].mxu1 %v5118_v60  ;;  %v4879_v60 = vld [vmem:[%s6180_s1 + $0x108] sm:$0xff]  }
  0xfa   : > { %4419 = vmatmul.mubr.bf16.gmra.mrb[16].mxu0 %v6223_v8  ;;  %4490 = vmatpush3.bf16.msra.mxu1 %v4878_v1  ;;  %v2852_v1 = vor.u32 %v2851_v27, %v2848_v39 }
  0xfb   : > { %4214 = vmatprep.mubr.bf16.mxu1 %v5189_v11  ;;  %4422 = vmatprep.mubr.bf16.mxu0 %v6224_v10  ;;  %v5861_v11 = vld [vmem:[%s4984_s16 + $0xd4] sm:$0x1] }
  0xfc   : > { %4483 = vmatprep.subr.bf16.mxu1 %v4879_v60  ;;  %v2865_v51 = vshll.u32 %v5861_v11, 16  ;;  %v2853_v32 = vrot.slane %v2852_v1, 4 }
  0xfe   : > { %4491 = vmatpush3.bf16.msra.mxu1 %v4879_v60  ;;  %v2867_v52 = vrot.slane %v2865_v51, 5 }
  0xff   : > { %4484 = vmatprep.subr.bf16.mxu1 %v4880_v7 }
 0x100   : > { %v2868_v2 = vsel %vm5029_vm2, %v2863_v47, %v2867_v52 }
 0x101   : > { %4215 = vmatmul.mubr.bf16.gmra.mrb[4].mxu1 %v5193_v15  ;;  %v4882_v15 = vld [vmem:[%s6180_s1 + $0x120] sm:$0xff]  }
 0x102   : > { %4423 = vmatmul.mubr.bf16.gmra.mrb[20].mxu0 %v6225_v20  ;;  %4218 = vmatprep.mubr.bf16.mxu1 %v5660_v12  ;;  %v2858_v12 = vsel %vm5029_vm2, %v2853_v32, %v2857_v24 }
 0x103   : > { %4426 = vmatprep.mubr.bf16.mxu0 %v5502_v55  ;;  %4492 = vmatpush3.bf16.msra.mxu1 %v4880_v7  ;;  %v3812_v34 = vcombine.low %v2858_v12, %v2868_v2 }
 0x104   : > { %4485 = vmatprep.subr.bf16.mxu1 %v4881_v5 }
 0x107   : > { %4493 = vmatpush3.bf16.msra.mxu1 %v4881_v5 }
 0x108   : > { %4486 = vmatprep.subr.bf16.mxu1 %v4882_v15 }
 0x109   : > { %4219 = vmatmul.mubr.bf16.gmra.mrb[8].mxu1 %v5666_v31  ;;  %v4884_v31 = vld [vmem:[%s6180_s1 + $0x130] sm:$0xff]  }
 0x10a   : > { %4427 = vmatmul.mubr.bf16.gmra.mrb[24].mxu0 %v5536_v61  ;;  %4222 = vmatprep.mubr.bf16.mxu1 %v5691_v41 }
 0x10b   : > { %4430 = vmatprep.mubr.bf16.mxu0 %v5699_v57  ;;  %4494 = vmatpush3.bf16.msra.mxu1 %v4882_v15 }
 0x10c   : > { %4487 = vmatprep.subr.bf16.mxu1 %v4883_v54 }
 0x10f   : > { %4495 = vmatpush3.bf16.msra.mxu1 %v4883_v54 }
 0x110   : > { %4488 = vmatprep.subr.bf16.mxu1 %v4884_v31 }
 0x111   : > { %4223 = vmatmul.mubr.bf16.gmra.mrb[12].mxu1 %v5581_v28 }
 0x112   : > { %4431 = vmatmul.mubr.bf16.gmra.mrb[28].mxu0 %v3812_v34  ;;  %4226 = vmatprep.mubr.bf16.mxu1 %v5592_v33 }
 0x113   : > { %4450 = vmatprep.mubr.bf16.mxu0 %v5330_v26  ;;  %4496 = vmatpush3.bf16.msra.mxu1 %v4884_v31  ;;  %v3117_v26 = vrot.slane %v5793_v62, 5 }
 0x114   : > { %4489 = vmatprep.subr.bf16.mxu1 %v4885_v37 }
 0x117   : > { %4497 = vmatpush3.bf16.msra.mxu1 %v4885_v37 }
 0x119   : > { %4227 = vmatmul.mubr.bf16.gmra.mrb[16].mxu1 %v5603_v45 }
 0x11a   : > { %4451 = vmatmul.mubr.bf16.vlgmr.msra.gmra.mrb[0].mxu0 %v5370_v46  ;;  %4230 = vmatprep.mubr.bf16.mxu1 %v5607_v40  ;;  %v3821_v46 = vrot.slane %v5790_v0, 9 }
 0x11b   : > { %4454 = vmatprep.mubr.bf16.mxu0 %v5407_v44  ;;  %v3119_v44 = vrot.slane %v3117_v26, 4 }
 0x121   : > { %4231 = vmatmul.mubr.bf16.gmra.mrb[20].mxu1 %v5611_v53 }
 0x122   : > { %4455 = vmatmul.mubr.bf16.gmra.mrb[4].mxu0 %v5440_v19  ;;  %4234 = vmatprep.mubr.bf16.mxu1 %v5615_v9  ;;  %v3120_v19 = vrot.slane %v5861_v11, 5 }
 0x123   : > { %4458 = vmatprep.mubr.bf16.mxu0 %v5472_v35  ;;  %v3118_v35 = vsel %vm5236_vm5, %v3821_v46, %v3117_v26 }
 0x129   : > { %4235 = vmatmul.mubr.bf16.gmra.mrb[24].mxu1 %v5619_v16 }
 0x12a   : > { %4459 = vmatmul.mubr.bf16.gmra.mrb[8].mxu0 %v5506_v21  ;;  %4238 = vmatprep.mubr.bf16.mxu1 %v5626_v38  ;;  %v3121_v21 = vsel %vm5236_vm5, %v3119_v44, %v3120_v19 }
 0x12b   : > { %4462 = vmatprep.mubr.bf16.mxu0 %v5538_v58  ;;  %v3822_v58 = vcombine.low %v3118_v35, %v3121_v21 }
 0x131   : > { %4239 = vmatmul.mubr.bf16.gmra.mrb[28].mxu1 %v5780_v48 }
 0x132   : > { %4463 = vmatmul.mubr.bf16.gmra.mrb[12].mxu0 %v5543_v18  ;;  %4274 = vmatprep.mubr.bf16.mxu1 %v6221_v49 }
 0x133   : > { %4466 = vmatprep.mubr.bf16.mxu0 %v5563_v13 }
 0x139   : > { %4275 = vmatmul.mubr.bf16.vlgmr.msra.gmra.mrb[16].mxu1 %v6222_v22 }
 0x13a   : > { %4467 = vmatmul.mubr.bf16.gmra.mrb[16].mxu0 %v5568_v29  ;;  %4278 = vmatprep.mubr.bf16.mxu1 %v6223_v8 }
 0x13b   : > { %4470 = vmatprep.mubr.bf16.mxu0 %v5621_v4 }
 0x141   : > { %4279 = vmatmul.mubr.bf16.gmra.mrb[20].mxu1 %v6224_v10 }
 0x142   : > { %4471 = vmatmul.mubr.bf16.gmra.mrb[20].mxu0 %v5628_v3  ;;  %4282 = vmatprep.mubr.bf16.mxu1 %v6225_v20 }
 0x143   : > { %4474 = vmatprep.mubr.bf16.mxu0 %v5662_v50 }
 0x149   : > { %4283 = vmatmul.mubr.bf16.gmra.mrb[24].mxu1 %v5502_v55 }
 0x14a   : > { %4475 = vmatmul.mubr.bf16.gmra.mrb[24].mxu0 %v5672_v42  ;;  %4286 = vmatprep.mubr.bf16.mxu1 %v5536_v61 }
 0x14b   : > { %4478 = vmatprep.mubr.bf16.mxu0 %v5693_v17 }
 0x151   : > { %4287 = vmatmul.mubr.bf16.gmra.mrb[28].mxu1 %v5699_v57 }
 0x152   : > { %4479 = vmatmul.mubr.bf16.gmra.mrb[28].mxu0 %v3822_v58 }
 0x1cc   : > { %v4212_v18 = vpop.f32.mrb[0].mxu1 }
 0x1cd   : > { %v1917_v13 = vpop.f32.mrb[1].mxu1 }
 0x1ce   : > { %v4213_v55 = vpop.f32.mrb[2].mxu1 }
 0x1cf   : > { %v1920_v29 = vpop.f32.mrb[3].mxu1 }
 0x1d4   : > { %v4216_v28 = vpop.f32.mrb[4].mxu1 }
 0x1d5   : > { %v1933_v33 = vpop.f32.mrb[5].mxu1 }
 0x1d6   : > { %v4217_v61 = vpop.f32.mrb[6].mxu1 }
 0x1d7   : > { %v1936_v45 = vpop.f32.mrb[7].mxu1 }
 0x1dc   : > { %v4220_v40 = vpop.f32.mrb[8].mxu1 }
 0x1dd   : > { %v1949_v53 = vpop.f32.mrb[9].mxu1 }
 0x1de   : > { %v4221_v9 = vpop.f32.mrb[10].mxu1 }
 0x1df   : > { %v1952_v16 = vpop.f32.mrb[11].mxu1 }
 0x1e4   : > { %v4224_v4 = vpop.f32.mrb[12].mxu1 }
 0x1e5   : > { %v1965_v23 = vpop.f32.mrb[13].mxu1 }
 0x1e6   : > { %v4225_v38 = vpop.f32.mrb[14].mxu1 }
 0x1e7   : > { %v1968_v3 = vpop.f32.mrb[15].mxu1 }
 0x1ed   : > { %v4452_v50 = vpop.f32.mrb[0].mxu0 }
 0x1ee   : > { %v5936_v42 = vadd.f32 %v4452_v50, %v4212_v18  ;;  %v3208_v41 = vpop.f32.mrb[1].mxu0 }
 0x1ef   : > { %v5938_v17 = vadd.f32 %v3208_v41, %v1917_v13  ;;  %v4453_v57 = vpop.f32.mrb[2].mxu0 }
 0x1f0   : > { %3369 = vst [vmem:[%s5934_s27 + $0x10] sm:$0xff] %v5936_v42  ;;  %v5942_v48 = vadd.f32 %v4453_v57, %v4213_v55  ;;  %v3211_v0 = vpop.f32.mrb[3].mxu0 }
 0x1f1   : > { %3367 = vst [vmem:[%s5934_s27] sm:$0xff] %v5938_v17  ;;  %v5946_v62 = vadd.f32 %v3211_v0, %v1920_v29 }
 0x1f2   : > { %3370 = vst [vmem:[%s5934_s27 + $0x18] sm:$0xff] %v5942_v48 }
 0x1f3   : > { %3368 = vst [vmem:[%s5934_s27 + $0x8] sm:$0xff] %v5946_v62  ;;  %v3399_v59 = vadd.f32 %v5946_v62, %v5938_v17 }
 0x1f5   : > { %v3400_v63 = vadd.f32 %v5936_v42, %v3399_v59  ;;  %v4456_v25 = vpop.f32.mrb[4].mxu0 }
 0x1f6   : > { %v5955_v49 = vadd.f32 %v4456_v25, %v4216_v28  ;;  %v3224_v22 = vpop.f32.mrb[5].mxu0 }
 0x1f7   : > { %v5957_v8 = vadd.f32 %v3224_v22, %v1933_v33  ;;  %v3401_v56 = vadd.f32 %v5942_v48, %v3400_v63  ;;  %v4457_v36 = vpop.f32.mrb[6].mxu0 }
 0x1f8   : > { %3373 = vst [vmem:[%s5934_s27 + $0x30] sm:$0xff] %v5955_v49  ;;  %v5962_v6 = vadd.f32 %v4457_v36, %v4217_v61  ;;  %v3227_v43 = vpop.f32.mrb[7].mxu0 }
 0x1f9   : > { %3371 = vst [vmem:[%s5934_s27 + $0x20] sm:$0xff] %v5957_v8  ;;  %v3402_v10 = vadd.f32 %v5957_v8, %v3401_v56  ;;  %v5967_v60 = vadd.f32 %v3227_v43, %v1936_v45 }
 0x1fa   : > { %3374 = vst [vmem:[%s5934_s27 + $0x38] sm:$0xff] %v5962_v6 }
 0x1fb   : > { %3372 = vst [vmem:[%s5934_s27 + $0x28] sm:$0xff] %v5967_v60  ;;  %v3403_v39 = vadd.f32 %v5967_v60, %v3402_v10 }
 0x1fd   : > { %v3404_v27 = vadd.f32 %v5955_v49, %v3403_v39  ;;  %v4460_v24 = vpop.f32.mrb[8].mxu0 }
 0x1fe   : > { %v5975_v14 = vadd.f32 %v4460_v24, %v4220_v40  ;;  %v3240_v7 = vpop.f32.mrb[9].mxu0 }
 0x1ff   : > { %v5977_v11 = vadd.f32 %v3240_v7, %v1949_v53  ;;  %v3405_v20 = vadd.f32 %v5962_v6, %v3404_v27  ;;  %v4461_v1 = vpop.f32.mrb[10].mxu0 }
 0x200   : > { %3377 = vst [vmem:[%s5934_s27 + $0x50] sm:$0xff] %v5975_v14  ;;  %v5982_v30 = vadd.f32 %v4461_v1, %v4221_v9  ;;  %v3243_v51 = vpop.f32.mrb[11].mxu0 }
 0x201   : > { %3375 = vst [vmem:[%s5934_s27 + $0x40] sm:$0xff] %v5977_v11  ;;  %v3406_v5 = vadd.f32 %v5977_v11, %v3405_v20  ;;  %v5987_v32 = vadd.f32 %v3243_v51, %v1952_v16 }
 0x202   : > { %3378 = vst [vmem:[%s5934_s27 + $0x58] sm:$0xff] %v5982_v30 }
 0x203   : > { %3376 = vst [vmem:[%s5934_s27 + $0x48] sm:$0xff] %v5987_v32  ;;  %v3407_v47 = vadd.f32 %v5987_v32, %v3406_v5 }
 0x205   : > { %v3408_v52 = vadd.f32 %v5975_v14, %v3407_v47  ;;  %v4464_v15 = vpop.f32.mrb[12].mxu0 }
 0x206   : > { %v5995_v12 = vadd.f32 %v4464_v15, %v4224_v4  ;;  %v3256_v2 = vpop.f32.mrb[13].mxu0 }
 0x207   : > { %v5997_v54 = vadd.f32 %v3256_v2, %v1965_v23  ;;  %v3409_v34 = vadd.f32 %v5982_v30, %v3408_v52  ;;  %v4465_v31 = vpop.f32.mrb[14].mxu0 }
 0x208   : > { %3381 = vst [vmem:[%s5934_s27 + $0x70] sm:$0xff] %v5995_v12  ;;  %v6002_v37 = vadd.f32 %v4465_v31, %v4225_v38  ;;  %v3259_v26 = vpop.f32.mrb[15].mxu0 }
 0x209   : > { %3379 = vst [vmem:[%s5934_s27 + $0x60] sm:$0xff] %v5997_v54  ;;  %v3410_v46 = vadd.f32 %v5997_v54, %v3409_v34  ;;  %v6007_v44 = vadd.f32 %v3259_v26, %v1968_v3 }
 0x20a   : > { %3382 = vst [vmem:[%s5934_s27 + $0x78] sm:$0xff] %v6002_v37 }
 0x20b   : > { %3380 = vst [vmem:[%s5934_s27 + $0x68] sm:$0xff] %v6007_v44  ;;  %v3411_v19 = vadd.f32 %v6007_v44, %v3410_v46 }
 0x20c   : > { %v4276_v21 = vpop.f32.mrb[16].mxu1 }
 0x20d   : > { %v3412_v35 = vadd.f32 %v5995_v12, %v3411_v19  ;;  %v4468_v58 = vpop.f32.mrb[16].mxu0  ;;  %v2250_v13 = vpop.f32.mrb[17].mxu1 }
 0x20e   : > { %v6015_v18 = vadd.f32 %v4468_v58, %v4276_v21  ;;  %v3272_v55 = vpop.f32.mrb[17].mxu0  ;;  %v4277_v33 = vpop.f32.mrb[18].mxu1 }
 0x20f   : > { %v6017_v29 = vadd.f32 %v3272_v55, %v2250_v13  ;;  %v3413_v28 = vadd.f32 %v6002_v37, %v3412_v35  ;;  %v4469_v61 = vpop.f32.mrb[18].mxu0  ;;  %v2253_v40 = vpop.f32.mrb[19].mxu1 }
 0x210   : > { %3385 = vst [vmem:[%s5934_s27 + $0x90] sm:$0xff] %v6015_v18  ;;  %v6022_v45 = vadd.f32 %v4469_v61, %v4277_v33  ;;  %v3275_v53 = vpop.f32.mrb[19].mxu0 }
 0x211   : > { %3383 = vst [vmem:[%s5934_s27 + $0x80] sm:$0xff] %v6017_v29  ;;  %v3414_v9 = vadd.f32 %v6017_v29, %v3413_v28  ;;  %v6027_v16 = vadd.f32 %v3275_v53, %v2253_v40 }
 0x212   : > { %3386 = vst [vmem:[%s5934_s27 + $0x98] sm:$0xff] %v6022_v45 }
 0x213   : > { %3384 = vst [vmem:[%s5934_s27 + $0x88] sm:$0xff] %v6027_v16  ;;  %v3415_v4 = vadd.f32 %v6027_v16, %v3414_v9 }
 0x214   : > { %v4280_v38 = vpop.f32.mrb[20].mxu1 }
 0x215   : > { %v3416_v23 = vadd.f32 %v6015_v18, %v3415_v4  ;;  %v4472_v3 = vpop.f32.mrb[20].mxu0  ;;  %v2266_v41 = vpop.f32.mrb[21].mxu1 }
 0x216   : > { %v6035_v50 = vadd.f32 %v4472_v3, %v4280_v38  ;;  %v3288_v57 = vpop.f32.mrb[21].mxu0  ;;  %v4281_v63 = vpop.f32.mrb[22].mxu1 }
 0x217   : > { %v6037_v0 = vadd.f32 %v3288_v57, %v2266_v41  ;;  %v3417_v59 = vadd.f32 %v6022_v45, %v3416_v23  ;;  %v4473_v25 = vpop.f32.mrb[22].mxu0  ;;  %v2269_v56 = vpop.f32.mrb[23].mxu1 }
 0x218   : > { %3389 = vst [vmem:[%s5934_s27 + $0xb0] sm:$0xff] %v6035_v50  ;;  %v6042_v22 = vadd.f32 %v4473_v25, %v4281_v63  ;;  %v3291_v36 = vpop.f32.mrb[23].mxu0 }
 0x219   : > { %3387 = vst [vmem:[%s5934_s27 + $0xa0] sm:$0xff] %v6037_v0  ;;  %v3418_v43 = vadd.f32 %v6037_v0, %v3417_v59  ;;  %v6047_v10 = vadd.f32 %v3291_v36, %v2269_v56 }
 0x21a   : > { %3390 = vst [vmem:[%s5934_s27 + $0xb8] sm:$0xff] %v6042_v22 }
 0x21b   : > { %3388 = vst [vmem:[%s5934_s27 + $0xa8] sm:$0xff] %v6047_v10  ;;  %v3419_v39 = vadd.f32 %v6047_v10, %v3418_v43 }
 0x21c   : > { %v4284_v24 = vpop.f32.mrb[24].mxu1 }
 0x21d   : > { %v3420_v27 = vadd.f32 %v6035_v50, %v3419_v39  ;;  %v4476_v7 = vpop.f32.mrb[24].mxu0  ;;  %v2282_v1 = vpop.f32.mrb[25].mxu1 }
 0x21e   : > { %v6055_v20 = vadd.f32 %v4476_v7, %v4284_v24  ;;  %v3304_v51 = vpop.f32.mrb[25].mxu0  ;;  %v4285_v52 = vpop.f32.mrb[26].mxu1 }
 0x21f   : > { %v6057_v5 = vadd.f32 %v3304_v51, %v2282_v1  ;;  %v3421_v47 = vadd.f32 %v6042_v22, %v3420_v27  ;;  %v4477_v15 = vpop.f32.mrb[26].mxu0  ;;  %v2285_v34 = vpop.f32.mrb[27].mxu1 }
 0x220   : > { %3393 = vst [vmem:[%s5934_s27 + $0xd0] sm:$0xff] %v6055_v20  ;;  %v6062_v2 = vadd.f32 %v4477_v15, %v4285_v52  ;;  %v3307_v31 = vpop.f32.mrb[27].mxu0 }
 0x221   : > { %3391 = vst [vmem:[%s5934_s27 + $0xc0] sm:$0xff] %v6057_v5  ;;  %v3422_v26 = vadd.f32 %v6057_v5, %v3421_v47  ;;  %v6067_v46 = vadd.f32 %v3307_v31, %v2285_v34 }
 0x222   : > { %3394 = vst [vmem:[%s5934_s27 + $0xd8] sm:$0xff] %v6062_v2 }
 0x223   : > { %3392 = vst [vmem:[%s5934_s27 + $0xc8] sm:$0xff] %v6067_v46  ;;  %v3423_v19 = vadd.f32 %v6067_v46, %v3422_v26 }
 0x224   : > { %v4288_v21 = vpop.f32.mrb[28].mxu1 }
 0x225   : > { %v3424_v35 = vadd.f32 %v6055_v20, %v3423_v19  ;;  %v4480_v58 = vpop.f32.mrb[28].mxu0  ;;  %v2298_v55 = vpop.f32.mrb[29].mxu1 }
 0x226   : > { %v6075_v13 = vadd.f32 %v4480_v58, %v4288_v21  ;;  %v3320_v28 = vpop.f32.mrb[29].mxu0  ;;  %v4289_v40 = vpop.f32.mrb[30].mxu1 }
 0x227   : > { %v6077_v33 = vadd.f32 %v3320_v28, %v2298_v55  ;;  %v3425_v61 = vadd.f32 %v6062_v2, %v3424_v35  ;;  %v4481_v53 = vpop.f32.mrb[30].mxu0  ;;  %v2301_v4 = vpop.f32.mrb[31].mxu1 }
 0x228   : > { %3397 = vst [vmem:[%s5934_s27 + $0xf0] sm:$0xff] %v6075_v13  ;;  %v6082_v9 = vadd.f32 %v4481_v53, %v4289_v40  ;;  %v3323_v23 = vpop.f32.mrb[31].mxu0 }
 0x229   : > { %3395 = vst [vmem:[%s5934_s27 + $0xe0] sm:$0xff] %v6077_v33  ;;  %v3426_v38 = vadd.f32 %v6077_v33, %v3425_v61  ;;  %v6087_v3 = vadd.f32 %v3323_v23, %v2301_v4 }
 0x22a   : > { %3398 = vst [vmem:[%s5934_s27 + $0xf8] sm:$0xff] %v6082_v9 }
 0x22b   : > { %3396 = vst [vmem:[%s5934_s27 + $0xe8] sm:$0xff] %v6087_v3  ;;  %v3427_v41 = vadd.f32 %v6087_v3, %v3426_v38 }
 0x22d   : > { %v3428_v57 = vadd.f32 %v6075_v13, %v3427_v41 }
 0x22f   : > { %v3429_v59 = vadd.f32 %v6082_v9, %v3428_v57 }
 0x231   : > { %v3430_v63 = vrot.slane %v3429_v59, 4 }
 0x233   : > { %v3431_v25 = vadd.f32 %v3430_v63, %v3429_v59 }
 0x235   : > { %v3432_v56 = vrot.slane %v3431_v25, 2 }
 0x237   : > { %v3433_v36 = vadd.f32 %v3432_v56, %v3431_v25 }
 0x239   : > { %v3434_v43 = vrot.slane %v3433_v36, 1 }
 0x23b   : > { %v6096_v39 = vadd.f32 %v3434_v43, %v3433_v36 }
 0x23d   : > { %v6099_v27 = vmul.f32 0.00390625, %v6096_v39 }
 0x23f   : > { %v3437_v24 = vsub.f32 %v5938_v17, %v6099_v27  ;;  %v3438_v7 = vsub.f32 %v5946_v62, %v6099_v27  ;;  %v3439_v1 = vsub.f32 %v5936_v42, %v6099_v27  ;;  %v3440_v52 = vsub.f32 %v5942_v48, %v6099_v27 }
 0x240   : > { %v3441_v15 = vsub.f32 %v5957_v8, %v6099_v27  ;;  %v3442_v26 = vsub.f32 %v5967_v60, %v6099_v27  ;;  %v3443_v62 = vsub.f32 %v5955_v49, %v6099_v27  ;;  %v3444_v21 = vsub.f32 %v5962_v6, %v6099_v27 }
 0x241   : > { %v3469_v51 = vmul.f32 %v3437_v24, %v3437_v24  ;;  %v3470_v47 = vmul.f32 %v3438_v7, %v3438_v7  ;;  %v3471_v34 = vmul.f32 %v3439_v1, %v3439_v1  ;;  %v3472_v17 = vmul.f32 %v3440_v52, %v3440_v52 }
 0x242   : > { %v3473_v35 = vmul.f32 %v3441_v15, %v3441_v15  ;;  %v3474_v58 = vmul.f32 %v3442_v26, %v3442_v26  ;;  %v3445_v8 = vsub.f32 %v5977_v11, %v6099_v27  ;;  %v3475_v55 = vmul.f32 %v3443_v62, %v3443_v62 }
 0x243   : > { %v3501_v31 = vadd.f32 %v3470_v47, %v3469_v51  ;;  %v3446_v60 = vsub.f32 %v5987_v32, %v6099_v27  ;;  %v3476_v61 = vmul.f32 %v3444_v21, %v3444_v21  ;;  %v3447_v49 = vsub.f32 %v5975_v14, %v6099_v27 }
 0x244   : > { %v3477_v53 = vmul.f32 %v3445_v8, %v3445_v8  ;;  %v3448_v6 = vsub.f32 %v5982_v30, %v6099_v27  ;;  %v3449_v11 = vsub.f32 %v5997_v54, %v6099_v27  ;;  %v3450_v32 = vsub.f32 %v6007_v44, %v6099_v27 }
 0x245   : > { %v3502_v19 = vadd.f32 %v3501_v31, %v3471_v34  ;;  %v3478_v23 = vmul.f32 %v3446_v60, %v3446_v60  ;;  %v3479_v41 = vmul.f32 %v3447_v49, %v3447_v49  ;;  %v3451_v14 = vsub.f32 %v5995_v12, %v6099_v27 }
 0x246   : > { %v3480_v59 = vmul.f32 %v3448_v6, %v3448_v6  ;;  %v3481_v25 = vmul.f32 %v3449_v11, %v3449_v11  ;;  %v3452_v30 = vsub.f32 %v6002_v37, %v6099_v27  ;;  %v3482_v36 = vmul.f32 %v3450_v32, %v3450_v32 }
 0x247   : > { %v3503_v42 = vadd.f32 %v3502_v19, %v3472_v17  ;;  %v3453_v54 = vsub.f32 %v6017_v29, %v6099_v27  ;;  %v3483_v24 = vmul.f32 %v3451_v14, %v3451_v14  ;;  %v3454_v44 = vsub.f32 %v6027_v16, %v6099_v27 }
 0x248   : > { %v3484_v1 = vmul.f32 %v3452_v30, %v3452_v30  ;;  %v3455_v12 = vsub.f32 %v6015_v18, %v6099_v27  ;;  %v3456_v37 = vsub.f32 %v6022_v45, %v6099_v27  ;;  %v3457_v29 = vsub.f32 %v6037_v0, %v6099_v27 }
 0x249   : > { %v3504_v48 = vadd.f32 %v3503_v42, %v3473_v35  ;;  %v3485_v47 = vmul.f32 %v3453_v54, %v3453_v54  ;;  %v3486_v15 = vmul.f32 %v3454_v44, %v3454_v44  ;;  %v3458_v16 = vsub.f32 %v6047_v10, %v6099_v27 }
 0x24a   : > { %v3487_v31 = vmul.f32 %v3455_v12, %v3455_v12  ;;  %v3488_v17 = vmul.f32 %v3456_v37, %v3456_v37  ;;  %v3459_v18 = vsub.f32 %v6035_v50, %v6099_v27  ;;  %v3489_v62 = vmul.f32 %v3457_v29, %v3457_v29 }
 0x24b   : > { %v3505_v28 = vadd.f32 %v3504_v48, %v3474_v58  ;;  %v3460_v45 = vsub.f32 %v6042_v22, %v6099_v27  ;;  %v3490_v42 = vmul.f32 %v3458_v16, %v3458_v16  ;;  %v3461_v0 = vsub.f32 %v6057_v5, %v6099_v27 }
 0x24c   : > { %v3491_v58 = vmul.f32 %v3459_v18, %v3459_v18  ;;  %v3462_v10 = vsub.f32 %v6067_v46, %v6099_v27  ;;  %v3463_v50 = vsub.f32 %v6055_v20, %v6099_v27  ;;  %v3464_v22 = vsub.f32 %v6062_v2, %v6099_v27 }
 0x24d   : > { %v3506_v40 = vadd.f32 %v3505_v28, %v3475_v55  ;;  %v3492_v8 = vmul.f32 %v3460_v45, %v3460_v45  ;;  %v3493_v28 = vmul.f32 %v3461_v0, %v3461_v0  ;;  %v3465_v5 = vsub.f32 %v6077_v33, %v6099_v27 }
 0x24e   : > { %v3495_v49 = vmul.f32 %v3463_v50, %v3463_v50  ;;  %v3466_v46 = vsub.f32 %v6087_v3, %v6099_v27  ;;  %v3467_v20 = vsub.f32 %v6075_v13, %v6099_v27  ;;  %v3468_v2 = vsub.f32 %v6082_v9, %v6099_v27 }
 0x24f   : > { %v3507_v4 = vadd.f32 %v3506_v40, %v3476_v61  ;;  %v3494_v61 = vmul.f32 %v3462_v10, %v3462_v10 }
 0x250   : > { %v3498_v11 = vmul.f32 %v3466_v46, %v3466_v46  ;;  %v3500_v32 = vmul.f32 %v3468_v2, %v3468_v2 }
 0x251   : > { %v3508_v38 = vadd.f32 %v3507_v4, %v3477_v53  ;;  %v3496_v4 = vmul.f32 %v3464_v22, %v3464_v22 }
 0x253   : > { %v3509_v57 = vadd.f32 %v3508_v38, %v3478_v23  ;;  %v3497_v23 = vmul.f32 %v3465_v5, %v3465_v5 }
 0x255   : > { %v3510_v63 = vadd.f32 %v3509_v57, %v3479_v41  ;;  %v3499_v57 = vmul.f32 %v3467_v20, %v3467_v20 }
 0x257   : > { %v3511_v56 = vadd.f32 %v3510_v63, %v3480_v59 }
 0x259   : > { %v3512_v43 = vadd.f32 %v3511_v56, %v3481_v25 }
 0x25b   : > { %v3513_v7 = vadd.f32 %v3512_v43, %v3482_v36 }
 0x25d   : > { %v3514_v51 = vadd.f32 %v3513_v7, %v3483_v24 }
 0x25f   : > { %v3515_v52 = vadd.f32 %v3514_v51, %v3484_v1 }
 0x261   : > { %v3516_v34 = vadd.f32 %v3515_v52, %v3485_v47 }
 0x263   : > { %v3517_v26 = vadd.f32 %v3516_v34, %v3486_v15 }
 0x265   : > { %v3518_v19 = vadd.f32 %v3517_v26, %v3487_v31 }
 0x267   : > { %v3519_v35 = vadd.f32 %v3518_v19, %v3488_v17 }
 0x269   : > { %v3520_v21 = vadd.f32 %v3519_v35, %v3489_v62 }
 0x26b   : > { %v3521_v48 = vadd.f32 %v3520_v21, %v3490_v42 }
 0x26d   : > { %v3522_v55 = vadd.f32 %v3521_v48, %v3491_v58 }
 0x26f   : > { %v3523_v60 = vadd.f32 %v3522_v55, %v3492_v8 }
 0x271   : > { %v3524_v40 = vadd.f32 %v3523_v60, %v3493_v28 }
 0x273   : > { %v3525_v53 = vadd.f32 %v3524_v40, %v3494_v61 }
 0x275   : > { %v3526_v6 = vadd.f32 %v3525_v53, %v3495_v49 }
 0x277   : > { %v3527_v38 = vadd.f32 %v3526_v6, %v3496_v4 }
 0x279   : > { %v3528_v41 = vadd.f32 %v3527_v38, %v3497_v23 }
 0x27b   : > { %v3529_v33 = vadd.f32 %v3528_v41, %v3498_v11 }
 0x27d   : > { %v3530_v59 = vadd.f32 %v3529_v33, %v3499_v57 }
 0x27f   : > { %v3531_v63 = vadd.f32 %v3530_v59, %v3500_v32 }
 0x281   : > { %v3532_v14 = vrot.slane %v3531_v63, 4 }
 0x283   : > { %v3533_v3 = vadd.f32 %v3532_v14, %v3531_v63 }
 0x285   : > { %v3534_v25 = vrot.slane %v3533_v3, 2 }
 0x287   : > { %v3535_v56 = vadd.f32 %v3534_v25, %v3533_v3 }
 0x289   : > { %v3536_v30 = vrot.slane %v3535_v56, 1 }
 0x28b   : > { %v3537_v13 = vadd.f32 %v3536_v30, %v3535_v56 }
 0x28d   : > { %v3539_v9 = vsel %vm3538_vm6, %v6096_v39, %v3537_v13 }
 0x28e   : > { %3540 = vst [vmem:[%s228_s4] sm:$0x3] %v3539_v9 }
 0x28f PF: > { %s14_s14 = sadd.s32 1, %s4908_s14   ;;  %s6226_s12 = smov %s4904_s13 }
 0x290   : > { %p11_p5 = scmp.ge.s32.totalorder %s14_s14, 4   ;;  %s6227_s13 = smov %s6229_s15 }
 0x292   :  { %13 = sbr.rel (!%p11_p5) target bundleno = 2 (0x2), region = 70 }

</bundles_post_ra>
